<compile_context>
chip_gen: v7x
topology: tpu7x:2x2x1
jax: 0.10.0
libtpu: 0.0.40
codegen_flags: <defaults>
</compile_context>

<pallas_src>
import functools

import jax
import jax.numpy as jnp
import numpy as np
from jax import lax
from jax.experimental import pallas as pl
from jax.experimental.pallas import tpu as pltpu


def _factorcl_kernel(
    x1_ref, x2_ref, y_ref,
    h0_w1_ref, h0_b1_ref, h0_w2_ref, h0_b2_ref,
    h1_w1_ref, h1_b1_ref, h1_w2_ref, h1_b2_ref,
    w1a_u_ref, w1a_y_ref, w1b_u_ref, w1b_y_ref,
    c_b1_ref, c_w2_ref, c_b2_ref, c_w3_ref, c_b3_ref,
    out_ref,
    *, inv_temperature: float, y_ohe_dim: int,
):
    f32 = jnp.float32
    bf16 = jnp.bfloat16
    n = x1_ref.shape[0]

    x1 = x1_ref[...]
    x2 = x2_ref[...]

    # F.normalize(x, dim=-1) == x / max(||x||, 1e-12) == x * rsqrt(max(||x||^2, 1e-24))
    def l2norm(x):
        ss = jnp.sum(x * x, axis=-1, keepdims=True)
        return x * lax.rsqrt(jnp.maximum(ss, 1e-24))

    # mlp_head: Linear -> ReLU -> Linear  (small D, keep f32)
    def head(x, w1_ref, b1_ref, w2_ref, b2_ref):
        h = jnp.maximum(jnp.dot(x, w1_ref[...], preferred_element_type=f32) + b1_ref[...], 0.0)
        return jnp.dot(h, w2_ref[...], preferred_element_type=f32) + b2_ref[...]

    u1 = head(l2norm(x1), h0_w1_ref, h0_b1_ref, h0_w2_ref, h0_b2_ref)
    u2 = head(l2norm(x2), h1_w1_ref, h1_b1_ref, h1_w2_ref, h1_b2_ref)

    # One-hot(y) built in-kernel (no wrapper-side gather / dispatch):
    # yohe @ W_y is a tiny exact (N, Y) @ (Y, H) f32 matmul.
    y_col = y_ref[...]                                                   # (N, 1) int32
    classes = lax.broadcasted_iota(jnp.int32, (n, y_ohe_dim), 1)
    yohe = (classes == y_col).astype(f32)                                # (N, Y)
    a_y = jnp.dot(yohe, w1a_y_ref[...], preferred_element_type=f32)      # (N, H)
    b_y = jnp.dot(yohe, w1b_y_ref[...], preferred_element_type=f32)      # (N, H)

    # Critic layer-1: bf16 MXU operands, f32 accumulation.  feat1 = [u1, yohe],
    # feat2 = [u2, yohe].  c_b1 is folded into B once (N*H adds, not N^2*H).
    A = jnp.dot(u1.astype(bf16), w1a_u_ref[...], preferred_element_type=f32) + a_y
    B = (jnp.dot(u2.astype(bf16), w1b_u_ref[...], preferred_element_type=f32)
         + b_y + c_b1_ref[...])

    c_w2 = c_w2_ref[...]            # (H, H) bf16 (pre-cast once in prepare_params)
    c_b2 = c_b2_ref[...]            # (1, H) f32
    w3 = c_w3_ref[...]              # (H, 1) f32
    b3 = c_b3_ref[...]              # (1, 1) f32
    hdim = A.shape[-1]

    # Positive-pair (diagonal) path as its own tiny matmul -- no iota mask,
    # and independent of how the pair dimension would be tiled when gridding.
    diag_z = jnp.maximum(A + B, 0.0).astype(bf16)                               # (N, H)
    h2_diag = jnp.maximum(jnp.dot(diag_z, c_w2, preferred_element_type=f32) + c_b2, 0.0)
    diag_sum = jnp.sum(h2_diag, axis=0, keepdims=True)                          # (1, H)

    # All-pairs path: Z[i,j,:] = relu(A[j] + B[i]) materialized directly in
    # bf16 (f32 add in vregs, packed on store), then ONE MXU layer-2 matmul.
    z = jnp.maximum(A[None, :, :] + B[:, None, :], 0.0).astype(bf16)            # (N, N, H)
    z = z.reshape(n * n, hdim)                                                  # (N*N, H)
    h2 = jnp.maximum(jnp.dot(z, c_w2, preferred_element_type=f32) + c_b2, 0.0)  # (N*N, H)
    all_sum = jnp.sum(h2, axis=0, keepdims=True)                                # (1, H)

    # Width-1 w3 projection folded onto the row-reduced sums.
    wd = jnp.dot(diag_sum, w3, preferred_element_type=f32)                      # (1, 1)
    wa = jnp.dot(all_sum, w3, preferred_element_type=f32)                       # (1, 1)

    diag_mean = wd * (1.0 / n) + b3
    all_mean = wa * (1.0 / (n * n)) + b3

    # CLUB upper bound: mean over positives minus mean over all pairs.
    out_ref[...] = (diag_mean - all_mean) * inv_temperature


def prepare_params(p):
    """One-time weight preprocessing (NOT per forward call): bf16 MXU operands."""
    q = dict(p)
    q["c_w1a_u"] = p["c_w1a_u"].astype(jnp.bfloat16)
    q["c_w1b_u"] = p["c_w1b_u"].astype(jnp.bfloat16)
    q["c_w2"] = p["c_w2"].astype(jnp.bfloat16)
    return q


def factorcl_sup_forward(x1, x2, y, params, *, y_ohe_dim, temperature=1.0):
    """Pallas implementation of FactorCLSUP.forward(x1, x2, y).

    `params` must come from prepare_params().  Everything (one-hot, heads,
    critic) runs inside a single pallas_call -- no surrounding XLA gathers,
    converts or reshapes per call.
    """
    n, d1 = x1.shape
    d2 = x2.shape[1]
    hidden = params["c_w2"].shape[0]

    y_i32 = y.astype(jnp.int32).reshape(n, 1)

    args = (
        x1, x2, y_i32,
        params["h0_w1"], params["h0_b1"], params["h0_w2"], params["h0_b2"],
        params["h1_w1"], params["h1_b1"], params["h1_w2"], params["h1_b2"],
        params["c_w1a_u"], params["c_w1a_y"], params["c_w1b_u"], params["c_w1b_y"],
        params["c_b1"], params["c_w2"], params["c_b2"], params["c_w3"], params["c_b3"],
    )

    # VMEM budget from the actual footprint (double-buffered inputs + bf16 z +
    # f32 h2 + diag path) plus headroom -- NOT the full physical VMEM.
    in_bytes = int(sum(int(np.prod(a.shape)) * jnp.dtype(a.dtype).itemsize for a in args))
    vmem_limit = int(2 * in_bytes + 6 * n * n * hidden + 6 * n * hidden + (4 << 20))

    flops = int(
        4 * n * d1 * d1 + 4 * n * d2 * d2          # two mlp_heads (2 matmuls each)
        + 4 * n * y_ohe_dim * hidden               # one-hot label matmuls
        + 2 * n * (d1 + d2) * hidden               # critic layer-1
        + 2 * (n * n + n) * hidden * hidden        # critic layer-2 (all pairs + diag)
        + 4 * hidden                               # w3 projections
    )
    cost = pl.CostEstimate(flops=flops, transcendentals=2 * n,
                           bytes_accessed=in_bytes + 4)

    def full_spec(a):
        nd = a.ndim
        return pl.BlockSpec(a.shape, lambda i, _nd=nd: (0,) * _nd)

    kernel = functools.partial(
        _factorcl_kernel,
        inv_temperature=1.0 / float(temperature),
        y_ohe_dim=int(y_ohe_dim),
    )

    out = pl.pallas_call(
        kernel,
        out_shape=jax.ShapeDtypeStruct((1, 1), jnp.float32),
        grid=(1,),
        in_specs=[full_spec(a) for a in args],
        out_specs=pl.BlockSpec((1, 1), lambda i: (0, 0)),
        compiler_params=pltpu.CompilerParams(
            dimension_semantics=("arbitrary",),
            vmem_limit_bytes=vmem_limit,
        ),
        cost_estimate=cost,
    )(*args)
    return out[0, 0]


def init_params(key, d1, d2, y_ohe_dim, hidden):
    """Deterministic synthetic parameters (shapes follow the module __init__)."""
    ks = list(jax.random.split(key, 17))

    def lin(k, fan_in, shape):
        return (jax.random.normal(k, shape, jnp.float32) / np.sqrt(fan_in)).astype(jnp.float32)

    p = {}
    # mlp_head(d1, d1) and mlp_head(d2, d2)
    p["h0_w1"] = lin(ks[0], d1, (d1, d1)); p["h0_b1"] = lin(ks[1], d1, (1, d1))
    p["h0_w2"] = lin(ks[2], d1, (d1, d1)); p["h0_b2"] = lin(ks[3], d1, (1, d1))
    p["h1_w1"] = lin(ks[4], d2, (d2, d2)); p["h1_b1"] = lin(ks[5], d2, (1, d2))
    p["h1_w2"] = lin(ks[6], d2, (d2, d2)); p["h1_b2"] = lin(ks[7], d2, (1, d2))
    # critic: Linear(d1+Y+d2+Y, H) -> ReLU -> Linear(H, H) -> ReLU -> Linear(H, 1)
    din = d1 + y_ohe_dim + d2 + y_ohe_dim
    p["c_w1a_u"] = lin(ks[8], din, (d1, hidden))
    p["c_w1a_y"] = lin(ks[9], din, (y_ohe_dim, hidden))
    p["c_w1b_u"] = lin(ks[10], din, (d2, hidden))
    p["c_w1b_y"] = lin(ks[11], din, (y_ohe_dim, hidden))
    p["c_b1"] = lin(ks[12], din, (1, hidden))
    p["c_w2"] = lin(ks[13], hidden, (hidden, hidden))
    p["c_b2"] = lin(ks[14], hidden, (1, hidden))
    p["c_w3"] = lin(ks[15], hidden, (hidden, 1))
    p["c_b3"] = lin(ks[16], hidden, (1, 1))
    return p


def reference_forward(x1, x2, y, p, *, y_ohe_dim, temperature=1.0):
    """Pure-JAX full-f32 mirror of the PyTorch semantics (torch-faithful)."""
    yohe = jax.nn.one_hot(y[:, 0].astype(jnp.int32), y_ohe_dim, dtype=jnp.float32)

    def l2norm(x):
        return x / jnp.maximum(jnp.linalg.norm(x, axis=-1, keepdims=True), 1e-12)

    def head(x, w1, b1, w2, b2):
        return jnp.maximum(x @ w1 + b1, 0.0) @ w2 + b2

    u1 = head(l2norm(x1), p["h0_w1"], p["h0_b1"], p["h0_w2"], p["h0_b2"])
    u2 = head(l2norm(x2), p["h1_w1"], p["h1_b1"], p["h1_w2"], p["h1_b2"])
    feat1 = jnp.concatenate([u1, yohe], axis=-1)
    feat2 = jnp.concatenate([u2, yohe], axis=-1)
    w1_full = jnp.concatenate(
        [p["c_w1a_u"], p["c_w1a_y"], p["c_w1b_u"], p["c_w1b_y"]], axis=0
    )
    n = x1.shape[0]
    x_tile = jnp.broadcast_to(feat1[None, :, :], (n, n, feat1.shape[-1]))  # [i,j]=feat1[j]
    y_tile = jnp.broadcast_to(feat2[:, None, :], (n, n, feat2.shape[-1]))  # [i,j]=feat2[i]
    inp = jnp.concatenate([x_tile, y_tile], axis=-1)
    h1 = jnp.maximum(inp @ w1_full + p["c_b1"], 0.0)
    h2 = jnp.maximum(h1 @ p["c_w2"] + p["c_b2"], 0.0)
    s = ((h2 @ p["c_w3"] + p["c_b3"])[..., 0]) / temperature               # (n, n)
    return jnp.mean(jnp.diagonal(s)) - jnp.mean(s)


def mirror_forward(x1, x2, y, p, *, y_ohe_dim, temperature=1.0):
    """Pure-JAX mirror of the kernel's exact arithmetic (bf16 layer-1/2, rsqrt)."""
    f32, bf16 = jnp.float32, jnp.bfloat16
    n = x1.shape[0]

    def l2norm(x):
        ss = jnp.sum(x * x, axis=-1, keepdims=True)
        return x * lax.rsqrt(jnp.maximum(ss, 1e-24))

    def head(x, w1, b1, w2, b2):
        h = jnp.maximum(jnp.dot(x, w1, preferred_element_type=f32) + b1, 0.0)
        return jnp.dot(h, w2, preferred_element_type=f32) + b2

    u1 = head(l2norm(x1), p["h0_w1"], p["h0_b1"], p["h0_w2"], p["h0_b2"])
    u2 = head(l2norm(x2), p["h1_w1"], p["h1_b1"], p["h1_w2"], p["h1_b2"])
    yohe = jax.nn.one_hot(y[:, 0].astype(jnp.int32), y_ohe_dim, dtype=f32)
    a_y = jnp.dot(yohe, p["c_w1a_y"], preferred_element_type=f32)
    b_y = jnp.dot(yohe, p["c_w1b_y"], preferred_element_type=f32)
    A = jnp.dot(u1.astype(bf16), p["c_w1a_u"], preferred_element_type=f32) + a_y
    B = (jnp.dot(u2.astype(bf16), p["c_w1b_u"], preferred_element_type=f32)
         + b_y + p["c_b1"])
    hdim = A.shape[-1]

    diag_z = jnp.maximum(A + B, 0.0).astype(bf16)
    h2_diag = jnp.maximum(
        jnp.dot(diag_z, p["c_w2"], preferred_element_type=f32) + p["c_b2"], 0.0)
    diag_sum = jnp.sum(h2_diag, axis=0, keepdims=True)

    z = jnp.maximum(A[None, :, :] + B[:, None, :], 0.0).astype(bf16).reshape(n * n, hdim)
    h2 = jnp.maximum(jnp.dot(z, p["c_w2"], preferred_element_type=f32) + p["c_b2"], 0.0)
    all_sum = jnp.sum(h2, axis=0, keepdims=True)

    wd = jnp.dot(diag_sum, p["c_w3"], preferred_element_type=f32)
    wa = jnp.dot(all_sum, p["c_w3"], preferred_element_type=f32)
    diag_mean = wd * (1.0 / n) + p["c_b3"]
    all_mean = wa * (1.0 / (n * n)) + p["c_b3"]
    loss = (diag_mean - all_mean) / temperature
    return loss[0, 0]


if __name__ == "__main__":
    # Small, module-consistent shapes.
    N = 8                 # batch
    D1 = D2 = 32          # feat_dims
    Y_OHE = 8             # y_ohe_dim (number of classes)
    HIDDEN = 512          # critic_hidden_dim (from module __init__)
    TEMP = 1.0

    key = jax.random.PRNGKey(0)
    k_x1, k_x2, k_y, k_p = jax.random.split(key, 4)
    x1 = jax.random.normal(k_x1, (N, D1), jnp.float32)
    x2 = jax.random.normal(k_x2, (N, D2), jnp.float32)
    y = jax.random.randint(k_y, (N, 1), 0, Y_OHE)

    params_f32 = init_params(k_p, D1, D2, Y_OHE, HIDDEN)
    params = prepare_params(params_f32)   # one-time bf16 cast of MXU weights

    loss = factorcl_sup_forward(x1, x2, y, params, y_ohe_dim=Y_OHE, temperature=TEMP)
    loss = jax.block_until_ready(loss)

    # Exact-arithmetic mirror (same bf16 MXU operands) -- tight tolerance.
    mirror = jax.block_until_ready(
        mirror_forward(x1, x2, y, params, y_ohe_dim=Y_OHE, temperature=TEMP))
    np.testing.assert_allclose(np.asarray(loss), np.asarray(mirror), rtol=5e-3, atol=5e-3)

    # Torch-faithful full-f32 reference -- loose tolerance (bf16 MXU operands).
    ref = jax.block_until_ready(
        reference_forward(x1, x2, y, params_f32, y_ohe_dim=Y_OHE, temperature=TEMP))
    np.testing.assert_allclose(np.asarray(loss), np.asarray(ref), rtol=5e-2, atol=5e-2)

    print("KERNEL_OK")
</pallas_src>

<mosaic_0001>
module attributes {stable_mosaic.version = 11 : i64} {
  func.func @_factorcl_kernel(%arg0: i32, %arg1: memref<8x32xf32, #tpu.memory_space<vmem>>, %arg2: memref<8x32xf32, #tpu.memory_space<vmem>>, %arg3: memref<8x1xi32, #tpu.memory_space<vmem>>, %arg4: memref<32x32xf32, #tpu.memory_space<vmem>>, %arg5: memref<1x32xf32, #tpu.memory_space<vmem>>, %arg6: memref<32x32xf32, #tpu.memory_space<vmem>>, %arg7: memref<1x32xf32, #tpu.memory_space<vmem>>, %arg8: memref<32x32xf32, #tpu.memory_space<vmem>>, %arg9: memref<1x32xf32, #tpu.memory_space<vmem>>, %arg10: memref<32x32xf32, #tpu.memory_space<vmem>>, %arg11: memref<1x32xf32, #tpu.memory_space<vmem>>, %arg12: memref<32x512xbf16, #tpu.memory_space<vmem>>, %arg13: memref<8x512xf32, #tpu.memory_space<vmem>>, %arg14: memref<32x512xbf16, #tpu.memory_space<vmem>>, %arg15: memref<8x512xf32, #tpu.memory_space<vmem>>, %arg16: memref<1x512xf32, #tpu.memory_space<vmem>>, %arg17: memref<512x512xbf16, #tpu.memory_space<vmem>>, %arg18: memref<1x512xf32, #tpu.memory_space<vmem>>, %arg19: memref<512x1xf32, #tpu.memory_space<vmem>>, %arg20: memref<1x1xf32, #tpu.memory_space<vmem>>, %arg21: memref<1x1xf32, #tpu.memory_space<vmem>>) attributes {dimension_semantics = [#tpu.dimension_semantics<arbitrary>], iteration_bounds = array<i64: 1>, scalar_prefetch = 0 : i64, scratch_operands = 0 : i64, tpu.core_type = #tpu.core_type<tc>, window_params = [{pipeline_mode = #tpu.pipeline_mode<synchronous>, transform_indices = @transform_0, window_bounds = array<i64: 8, 32>}, {pipeline_mode = #tpu.pipeline_mode<synchronous>, transform_indices = @transform_1, window_bounds = array<i64: 8, 32>}, {pipeline_mode = #tpu.pipeline_mode<synchronous>, transform_indices = @transform_2, window_bounds = array<i64: 8, 1>}, {pipeline_mode = #tpu.pipeline_mode<synchronous>, transform_indices = @transform_3, window_bounds = array<i64: 32, 32>}, {pipeline_mode = #tpu.pipeline_mode<synchronous>, transform_indices = @transform_4, window_bounds = array<i64: 1, 32>}, {pipeline_mode = #tpu.pipeline_mode<synchronous>, transform_indices = @transform_5, window_bounds = array<i64: 32, 32>}, {pipeline_mode = #tpu.pipeline_mode<synchronous>, transform_indices = @transform_6, window_bounds = array<i64: 1, 32>}, {pipeline_mode = #tpu.pipeline_mode<synchronous>, transform_indices = @transform_7, window_bounds = array<i64: 32, 32>}, {pipeline_mode = #tpu.pipeline_mode<synchronous>, transform_indices = @transform_8, window_bounds = array<i64: 1, 32>}, {pipeline_mode = #tpu.pipeline_mode<synchronous>, transform_indices = @transform_9, window_bounds = array<i64: 32, 32>}, {pipeline_mode = #tpu.pipeline_mode<synchronous>, transform_indices = @transform_10, window_bounds = array<i64: 1, 32>}, {pipeline_mode = #tpu.pipeline_mode<synchronous>, transform_indices = @transform_11, window_bounds = array<i64: 32, 512>}, {pipeline_mode = #tpu.pipeline_mode<synchronous>, transform_indices = @transform_12, window_bounds = array<i64: 8, 512>}, {pipeline_mode = #tpu.pipeline_mode<synchronous>, transform_indices = @transform_13, window_bounds = array<i64: 32, 512>}, {pipeline_mode = #tpu.pipeline_mode<synchronous>, transform_indices = @transform_14, window_bounds = array<i64: 8, 512>}, {pipeline_mode = #tpu.pipeline_mode<synchronous>, transform_indices = @transform_15, window_bounds = array<i64: 1, 512>}, {pipeline_mode = #tpu.pipeline_mode<synchronous>, transform_indices = @transform_16, window_bounds = array<i64: 512, 512>}, {pipeline_mode = #tpu.pipeline_mode<synchronous>, transform_indices = @transform_17, window_bounds = array<i64: 1, 512>}, {pipeline_mode = #tpu.pipeline_mode<synchronous>, transform_indices = @transform_18, window_bounds = array<i64: 512, 1>}, {pipeline_mode = #tpu.pipeline_mode<synchronous>, transform_indices = @transform_19, window_bounds = array<i64: 1, 1>}, {pipeline_mode = #tpu.pipeline_mode<synchronous>, transform_indices = @transform_20, window_bounds = array<i64: 1, 1>}]} {
    %c0 = arith.constant 0 : index
    %c0_0 = arith.constant 0 : index
    %0 = vector.load %arg1[%c0, %c0_0] : memref<8x32xf32, #tpu.memory_space<vmem>>, vector<8x32xf32>
    %c0_1 = arith.constant 0 : index
    %c0_2 = arith.constant 0 : index
    %1 = vector.load %arg2[%c0_1, %c0_2] : memref<8x32xf32, #tpu.memory_space<vmem>>, vector<8x32xf32>
    %2 = arith.mulf %0, %0 : vector<8x32xf32>
    %cst = arith.constant dense<0.000000e+00> : vector<8xf32>
    %3 = vector.multi_reduction <add>, %2, %cst [1] : vector<8x32xf32> to vector<8xf32>
    %4 = vector.shape_cast %3 : vector<8xf32> to vector<8x1xf32>
    %cst_3 = arith.constant 1.000000e-24 : f32
    %5 = vector.broadcast %cst_3 : f32 to vector<8x1xf32>
    %6 = arith.maximumf %4, %5 : vector<8x1xf32>
    %7 = math.rsqrt %6 : vector<8x1xf32>
    %8 = vector.broadcast %7 : vector<8x1xf32> to vector<8x32xf32>
    %9 = arith.mulf %0, %8 : vector<8x32xf32>
    %c0_4 = arith.constant 0 : index
    %c0_5 = arith.constant 0 : index
    %10 = vector.load %arg4[%c0_4, %c0_5] : memref<32x32xf32, #tpu.memory_space<vmem>>, vector<32x32xf32>
    %cst_6 = arith.constant dense<0.000000e+00> : vector<8x32xf32>
    %11 = tpu.matmul %9, %10, %cst_6 {dimension_numbers = #tpu.dot_dimension_numbers<[1], [0], [0], [1], [0, 0, 1, 1], [], []>} : vector<8x32xf32>, vector<32x32xf32>, vector<8x32xf32> -> vector<8x32xf32>
    %c0_7 = arith.constant 0 : index
    %c0_8 = arith.constant 0 : index
    %12 = vector.load %arg5[%c0_7, %c0_8] : memref<1x32xf32, #tpu.memory_space<vmem>>, vector<1x32xf32>
    %13 = vector.broadcast %12 : vector<1x32xf32> to vector<8x32xf32>
    %14 = arith.addf %11, %13 : vector<8x32xf32>
    %cst_9 = arith.constant 0.000000e+00 : f32
    %15 = vector.broadcast %cst_9 : f32 to vector<8x32xf32>
    %16 = arith.maximumf %14, %15 : vector<8x32xf32>
    %c0_10 = arith.constant 0 : index
    %c0_11 = arith.constant 0 : index
    %17 = vector.load %arg6[%c0_10, %c0_11] : memref<32x32xf32, #tpu.memory_space<vmem>>, vector<32x32xf32>
    %cst_12 = arith.constant dense<0.000000e+00> : vector<8x32xf32>
    %18 = tpu.matmul %16, %17, %cst_12 {dimension_numbers = #tpu.dot_dimension_numbers<[1], [0], [0], [1], [0, 0, 1, 1], [], []>} : vector<8x32xf32>, vector<32x32xf32>, vector<8x32xf32> -> vector<8x32xf32>
    %c0_13 = arith.constant 0 : index
    %c0_14 = arith.constant 0 : index
    %19 = vector.load %arg7[%c0_13, %c0_14] : memref<1x32xf32, #tpu.memory_space<vmem>>, vector<1x32xf32>
    %20 = vector.broadcast %19 : vector<1x32xf32> to vector<8x32xf32>
    %21 = arith.addf %18, %20 : vector<8x32xf32>
    %22 = arith.mulf %1, %1 : vector<8x32xf32>
    %cst_15 = arith.constant dense<0.000000e+00> : vector<8xf32>
    %23 = vector.multi_reduction <add>, %22, %cst_15 [1] : vector<8x32xf32> to vector<8xf32>
    %24 = vector.shape_cast %23 : vector<8xf32> to vector<8x1xf32>
    %cst_16 = arith.constant 1.000000e-24 : f32
    %25 = vector.broadcast %cst_16 : f32 to vector<8x1xf32>
    %26 = arith.maximumf %24, %25 : vector<8x1xf32>
    %27 = math.rsqrt %26 : vector<8x1xf32>
    %28 = vector.broadcast %27 : vector<8x1xf32> to vector<8x32xf32>
    %29 = arith.mulf %1, %28 : vector<8x32xf32>
    %c0_17 = arith.constant 0 : index
    %c0_18 = arith.constant 0 : index
    %30 = vector.load %arg8[%c0_17, %c0_18] : memref<32x32xf32, #tpu.memory_space<vmem>>, vector<32x32xf32>
    %cst_19 = arith.constant dense<0.000000e+00> : vector<8x32xf32>
    %31 = tpu.matmul %29, %30, %cst_19 {dimension_numbers = #tpu.dot_dimension_numbers<[1], [0], [0], [1], [0, 0, 1, 1], [], []>} : vector<8x32xf32>, vector<32x32xf32>, vector<8x32xf32> -> vector<8x32xf32>
    %c0_20 = arith.constant 0 : index
    %c0_21 = arith.constant 0 : index
    %32 = vector.load %arg9[%c0_20, %c0_21] : memref<1x32xf32, #tpu.memory_space<vmem>>, vector<1x32xf32>
    %33 = vector.broadcast %32 : vector<1x32xf32> to vector<8x32xf32>
    %34 = arith.addf %31, %33 : vector<8x32xf32>
    %cst_22 = arith.constant 0.000000e+00 : f32
    %35 = vector.broadcast %cst_22 : f32 to vector<8x32xf32>
    %36 = arith.maximumf %34, %35 : vector<8x32xf32>
    %c0_23 = arith.constant 0 : index
    %c0_24 = arith.constant 0 : index
    %37 = vector.load %arg10[%c0_23, %c0_24] : memref<32x32xf32, #tpu.memory_space<vmem>>, vector<32x32xf32>
    %cst_25 = arith.constant dense<0.000000e+00> : vector<8x32xf32>
    %38 = tpu.matmul %36, %37, %cst_25 {dimension_numbers = #tpu.dot_dimension_numbers<[1], [0], [0], [1], [0, 0, 1, 1], [], []>} : vector<8x32xf32>, vector<32x32xf32>, vector<8x32xf32> -> vector<8x32xf32>
    %c0_26 = arith.constant 0 : index
    %c0_27 = arith.constant 0 : index
    %39 = vector.load %arg11[%c0_26, %c0_27] : memref<1x32xf32, #tpu.memory_space<vmem>>, vector<1x32xf32>
    %40 = vector.broadcast %39 : vector<1x32xf32> to vector<8x32xf32>
    %41 = arith.addf %38, %40 : vector<8x32xf32>
    %c0_28 = arith.constant 0 : index
    %c0_29 = arith.constant 0 : index
    %42 = vector.load %arg3[%c0_28, %c0_29] : memref<8x1xi32, #tpu.memory_space<vmem>>, vector<8x1xi32>
    %43 = tpu.iota {dimensions = array<i32: 1>} : vector<8x8xi32>
    %44 = vector.broadcast %42 : vector<8x1xi32> to vector<8x8xi32>
    %45 = arith.cmpi eq, %43, %44 : vector<8x8xi32>
    %46 = arith.extui %45 : vector<8x8xi1> to vector<8x8xi32>
    %47 = arith.sitofp %46 : vector<8x8xi32> to vector<8x8xf32>
    %c0_30 = arith.constant 0 : index
    %c0_31 = arith.constant 0 : index
    %48 = vector.load %arg13[%c0_30, %c0_31] : memref<8x512xf32, #tpu.memory_space<vmem>>, vector<8x512xf32>
    %cst_32 = arith.constant dense<0.000000e+00> : vector<8x512xf32>
    %49 = tpu.matmul %47, %48, %cst_32 {dimension_numbers = #tpu.dot_dimension_numbers<[1], [0], [0], [1], [0, 0, 1, 1], [], []>} : vector<8x8xf32>, vector<8x512xf32>, vector<8x512xf32> -> vector<8x512xf32>
    %c0_33 = arith.constant 0 : index
    %c0_34 = arith.constant 0 : index
    %50 = vector.load %arg15[%c0_33, %c0_34] : memref<8x512xf32, #tpu.memory_space<vmem>>, vector<8x512xf32>
    %cst_35 = arith.constant dense<0.000000e+00> : vector<8x512xf32>
    %51 = tpu.matmul %47, %50, %cst_35 {dimension_numbers = #tpu.dot_dimension_numbers<[1], [0], [0], [1], [0, 0, 1, 1], [], []>} : vector<8x8xf32>, vector<8x512xf32>, vector<8x512xf32> -> vector<8x512xf32>
    %52 = arith.truncf %21 : vector<8x32xf32> to vector<8x32xbf16>
    %c0_36 = arith.constant 0 : index
    %c0_37 = arith.constant 0 : index
    %53 = vector.load %arg12[%c0_36, %c0_37] : memref<32x512xbf16, #tpu.memory_space<vmem>>, vector<32x512xbf16>
    %cst_38 = arith.constant dense<0.000000e+00> : vector<8x512xf32>
    %54 = tpu.matmul %52, %53, %cst_38 {dimension_numbers = #tpu.dot_dimension_numbers<[1], [0], [0], [1], [0, 0, 1, 1], [], []>} : vector<8x32xbf16>, vector<32x512xbf16>, vector<8x512xf32> -> vector<8x512xf32>
    %55 = arith.addf %54, %49 : vector<8x512xf32>
    %56 = arith.truncf %41 : vector<8x32xf32> to vector<8x32xbf16>
    %c0_39 = arith.constant 0 : index
    %c0_40 = arith.constant 0 : index
    %57 = vector.load %arg14[%c0_39, %c0_40] : memref<32x512xbf16, #tpu.memory_space<vmem>>, vector<32x512xbf16>
    %cst_41 = arith.constant dense<0.000000e+00> : vector<8x512xf32>
    %58 = tpu.matmul %56, %57, %cst_41 {dimension_numbers = #tpu.dot_dimension_numbers<[1], [0], [0], [1], [0, 0, 1, 1], [], []>} : vector<8x32xbf16>, vector<32x512xbf16>, vector<8x512xf32> -> vector<8x512xf32>
    %59 = arith.addf %58, %51 : vector<8x512xf32>
    %c0_42 = arith.constant 0 : index
    %c0_43 = arith.constant 0 : index
    %60 = vector.load %arg16[%c0_42, %c0_43] : memref<1x512xf32, #tpu.memory_space<vmem>>, vector<1x512xf32>
    %61 = vector.broadcast %60 : vector<1x512xf32> to vector<8x512xf32>
    %62 = arith.addf %59, %61 : vector<8x512xf32>
    %c0_44 = arith.constant 0 : index
    %c0_45 = arith.constant 0 : index
    %63 = vector.load %arg17[%c0_44, %c0_45] : memref<512x512xbf16, #tpu.memory_space<vmem>>, vector<512x512xbf16>
    %c0_46 = arith.constant 0 : index
    %c0_47 = arith.constant 0 : index
    %64 = vector.load %arg18[%c0_46, %c0_47] : memref<1x512xf32, #tpu.memory_space<vmem>>, vector<1x512xf32>
    %c0_48 = arith.constant 0 : index
    %c0_49 = arith.constant 0 : index
    %65 = vector.load %arg19[%c0_48, %c0_49] : memref<512x1xf32, #tpu.memory_space<vmem>>, vector<512x1xf32>
    %c0_50 = arith.constant 0 : index
    %c0_51 = arith.constant 0 : index
    %66 = vector.load %arg20[%c0_50, %c0_51] : memref<1x1xf32, #tpu.memory_space<vmem>>, vector<1x1xf32>
    %67 = arith.addf %55, %62 : vector<8x512xf32>
    %cst_52 = arith.constant 0.000000e+00 : f32
    %68 = vector.broadcast %cst_52 : f32 to vector<8x512xf32>
    %69 = arith.maximumf %67, %68 : vector<8x512xf32>
    %70 = arith.truncf %69 : vector<8x512xf32> to vector<8x512xbf16>
    %cst_53 = arith.constant dense<0.000000e+00> : vector<8x512xf32>
    %71 = tpu.matmul %70, %63, %cst_53 {dimension_numbers = #tpu.dot_dimension_numbers<[1], [0], [0], [1], [0, 0, 1, 1], [], []>} : vector<8x512xbf16>, vector<512x512xbf16>, vector<8x512xf32> -> vector<8x512xf32>
    %72 = vector.broadcast %64 : vector<1x512xf32> to vector<8x512xf32>
    %73 = arith.addf %71, %72 : vector<8x512xf32>
    %cst_54 = arith.constant 0.000000e+00 : f32
    %74 = vector.broadcast %cst_54 : f32 to vector<8x512xf32>
    %75 = arith.maximumf %73, %74 : vector<8x512xf32>
    %cst_55 = arith.constant dense<0.000000e+00> : vector<512xf32>
    %76 = vector.multi_reduction <add>, %75, %cst_55 [0] : vector<8x512xf32> to vector<512xf32>
    %77 = vector.shape_cast %76 : vector<512xf32> to vector<1x512xf32>
    %78 = vector.shape_cast %55 : vector<8x512xf32> to vector<1x8x512xf32>
    %79 = vector.shape_cast %62 : vector<8x512xf32> to vector<8x1x512xf32>
    %80 = vector.broadcast %78 : vector<1x8x512xf32> to vector<8x8x512xf32>
    %81 = vector.broadcast %79 : vector<8x1x512xf32> to vector<8x8x512xf32>
    %82 = arith.addf %80, %81 : vector<8x8x512xf32>
    %cst_56 = arith.constant 0.000000e+00 : f32
    %83 = vector.broadcast %cst_56 : f32 to vector<8x8x512xf32>
    %84 = arith.maximumf %82, %83 : vector<8x8x512xf32>
    %85 = arith.truncf %84 : vector<8x8x512xf32> to vector<8x8x512xbf16>
    %86 = vector.shape_cast %85 : vector<8x8x512xbf16> to vector<64x512xbf16>
    %cst_57 = arith.constant dense<0.000000e+00> : vector<64x512xf32>
    %87 = tpu.matmul %86, %63, %cst_57 {dimension_numbers = #tpu.dot_dimension_numbers<[1], [0], [0], [1], [0, 0, 1, 1], [], []>} : vector<64x512xbf16>, vector<512x512xbf16>, vector<64x512xf32> -> vector<64x512xf32>
    %88 = vector.broadcast %64 : vector<1x512xf32> to vector<64x512xf32>
    %89 = arith.addf %87, %88 : vector<64x512xf32>
    %cst_58 = arith.constant 0.000000e+00 : f32
    %90 = vector.broadcast %cst_58 : f32 to vector<64x512xf32>
    %91 = arith.maximumf %89, %90 : vector<64x512xf32>
    %cst_59 = arith.constant dense<0.000000e+00> : vector<512xf32>
    %92 = vector.multi_reduction <add>, %91, %cst_59 [0] : vector<64x512xf32> to vector<512xf32>
    %93 = vector.shape_cast %92 : vector<512xf32> to vector<1x512xf32>
    %cst_60 = arith.constant dense<0.000000e+00> : vector<1x1xf32>
    %94 = tpu.matmul %77, %65, %cst_60 {dimension_numbers = #tpu.dot_dimension_numbers<[1], [0], [0], [1], [0, 0, 1, 1], [], []>} : vector<1x512xf32>, vector<512x1xf32>, vector<1x1xf32> -> vector<1x1xf32>
    %cst_61 = arith.constant dense<0.000000e+00> : vector<1x1xf32>
    %95 = tpu.matmul %93, %65, %cst_61 {dimension_numbers = #tpu.dot_dimension_numbers<[1], [0], [0], [1], [0, 0, 1, 1], [], []>} : vector<1x512xf32>, vector<512x1xf32>, vector<1x1xf32> -> vector<1x1xf32>
    %cst_62 = arith.constant 1.250000e-01 : f32
    %96 = vector.broadcast %cst_62 : f32 to vector<1x1xf32>
    %97 = arith.mulf %94, %96 : vector<1x1xf32>
    %98 = arith.addf %97, %66 : vector<1x1xf32>
    %cst_63 = arith.constant 1.562500e-02 : f32
    %99 = vector.broadcast %cst_63 : f32 to vector<1x1xf32>
    %100 = arith.mulf %95, %99 : vector<1x1xf32>
    %101 = arith.addf %100, %66 : vector<1x1xf32>
    %102 = arith.subf %98, %101 : vector<1x1xf32>
    %cst_64 = arith.constant 1.000000e+00 : f32
    %103 = vector.broadcast %cst_64 : f32 to vector<1x1xf32>
    %104 = arith.mulf %102, %103 : vector<1x1xf32>
    %c0_65 = arith.constant 0 : index
    %c0_66 = arith.constant 0 : index
    %105 = vector.load %arg21[%c0_65, %c0_66] : memref<1x1xf32, #tpu.memory_space<vmem>>, vector<1x1xf32>
    tpu.vector_store %arg21[%c0_65, %c0_66], %104 {strides = array<i32>} : memref<1x1xf32, #tpu.memory_space<vmem>>, vector<1x1xf32>,
    return
  }
  func.func @transform_0(%arg0: i32) -> (i32, i32) {
    %c0_i32 = arith.constant 0 : i32
    %c0_i32_0 = arith.constant 0 : i32
    %c0_i32_1 = arith.constant 0 : i32
    return %c0_i32, %c0_i32_0 : i32, i32
  }
  func.func @transform_1(%arg0: i32) -> (i32, i32) {
    %c0_i32 = arith.constant 0 : i32
    %c0_i32_0 = arith.constant 0 : i32
    %c0_i32_1 = arith.constant 0 : i32
    return %c0_i32, %c0_i32_0 : i32, i32
  }
  func.func @transform_2(%arg0: i32) -> (i32, i32) {
    %c0_i32 = arith.constant 0 : i32
    %c0_i32_0 = arith.constant 0 : i32
    %c0_i32_1 = arith.constant 0 : i32
    return %c0_i32, %c0_i32_0 : i32, i32
  }
  func.func @transform_3(%arg0: i32) -> (i32, i32) {
    %c0_i32 = arith.constant 0 : i32
    %c0_i32_0 = arith.constant 0 : i32
    %c0_i32_1 = arith.constant 0 : i32
    return %c0_i32, %c0_i32_0 : i32, i32
  }
  func.func @transform_4(%arg0: i32) -> (i32, i32) {
    %c0_i32 = arith.constant 0 : i32
    %c0_i32_0 = arith.constant 0 : i32
    %c0_i32_1 = arith.constant 0 : i32
    return %c0_i32, %c0_i32_0 : i32, i32
  }
  func.func @transform_5(%arg0: i32) -> (i32, i32) {
    %c0_i32 = arith.constant 0 : i32
    %c0_i32_0 = arith.constant 0 : i32
    %c0_i32_1 = arith.constant 0 : i32
    return %c0_i32, %c0_i32_0 : i32, i32
  }
  func.func @transform_6(%arg0: i32) -> (i32, i32) {
    %c0_i32 = arith.constant 0 : i32
    %c0_i32_0 = arith.constant 0 : i32
    %c0_i32_1 = arith.constant 0 : i32
    return %c0_i32, %c0_i32_0 : i32, i32
  }
  func.func @transform_7(%arg0: i32) -> (i32, i32) {
    %c0_i32 = arith.constant 0 : i32
    %c0_i32_0 = arith.constant 0 : i32
    %c0_i32_1 = arith.constant 0 : i32
    return %c0_i32, %c0_i32_0 : i32, i32
  }
  func.func @transform_8(%arg0: i32) -> (i32, i32) {
    %c0_i32 = arith.constant 0 : i32
    %c0_i32_0 = arith.constant 0 : i32
    %c0_i32_1 = arith.constant 0 : i32
    return %c0_i32, %c0_i32_0 : i32, i32
  }
  func.func @transform_9(%arg0: i32) -> (i32, i32) {
    %c0_i32 = arith.constant 0 : i32
    %c0_i32_0 = arith.constant 0 : i32
    %c0_i32_1 = arith.constant 0 : i32
    return %c0_i32, %c0_i32_0 : i32, i32
  }
  func.func @transform_10(%arg0: i32) -> (i32, i32) {
    %c0_i32 = arith.constant 0 : i32
    %c0_i32_0 = arith.constant 0 : i32
    %c0_i32_1 = arith.constant 0 : i32
    return %c0_i32, %c0_i32_0 : i32, i32
  }
  func.func @transform_11(%arg0: i32) -> (i32, i32) {
    %c0_i32 = arith.constant 0 : i32
    %c0_i32_0 = arith.constant 0 : i32
    %c0_i32_1 = arith.constant 0 : i32
    return %c0_i32, %c0_i32_0 : i32, i32
  }
  func.func @transform_12(%arg0: i32) -> (i32, i32) {
    %c0_i32 = arith.constant 0 : i32
    %c0_i32_0 = arith.constant 0 : i32
    %c0_i32_1 = arith.constant 0 : i32
    return %c0_i32, %c0_i32_0 : i32, i32
  }
  func.func @transform_13(%arg0: i32) -> (i32, i32) {
    %c0_i32 = arith.constant 0 : i32
    %c0_i32_0 = arith.constant 0 : i32
    %c0_i32_1 = arith.constant 0 : i32
    return %c0_i32, %c0_i32_0 : i32, i32
  }
  func.func @transform_14(%arg0: i32) -> (i32, i32) {
    %c0_i32 = arith.constant 0 : i32
    %c0_i32_0 = arith.constant 0 : i32
    %c0_i32_1 = arith.constant 0 : i32
    return %c0_i32, %c0_i32_0 : i32, i32
  }
  func.func @transform_15(%arg0: i32) -> (i32, i32) {
    %c0_i32 = arith.constant 0 : i32
    %c0_i32_0 = arith.constant 0 : i32
    %c0_i32_1 = arith.constant 0 : i32
    return %c0_i32, %c0_i32_0 : i32, i32
  }
  func.func @transform_16(%arg0: i32) -> (i32, i32) {
    %c0_i32 = arith.constant 0 : i32
    %c0_i32_0 = arith.constant 0 : i32
    %c0_i32_1 = arith.constant 0 : i32
    return %c0_i32, %c0_i32_0 : i32, i32
  }
  func.func @transform_17(%arg0: i32) -> (i32, i32) {
    %c0_i32 = arith.constant 0 : i32
    %c0_i32_0 = arith.constant 0 : i32
    %c0_i32_1 = arith.constant 0 : i32
    return %c0_i32, %c0_i32_0 : i32, i32
  }
  func.func @transform_18(%arg0: i32) -> (i32, i32) {
    %c0_i32 = arith.constant 0 : i32
    %c0_i32_0 = arith.constant 0 : i32
    %c0_i32_1 = arith.constant 0 : i32
    return %c0_i32, %c0_i32_0 : i32, i32
  }
  func.func @transform_19(%arg0: i32) -> (i32, i32) {
    %c0_i32 = arith.constant 0 : i32
    %c0_i32_0 = arith.constant 0 : i32
    %c0_i32_1 = arith.constant 0 : i32
    return %c0_i32, %c0_i32_0 : i32, i32
  }
  func.func @transform_20(%arg0: i32) -> (i32, i32) {
    %c0_i32 = arith.constant 0 : i32
    %c0_i32_0 = arith.constant 0 : i32
    %c0_i32_1 = arith.constant 0 : i32
    return %c0_i32, %c0_i32_0 : i32, i32
  }
}

</mosaic_0001>

<bundles_post_ra>
// kernel: tpu_custom_call.1
= control target key start
LH: loop header
LB: loop body
LE: loop exit
PB: predicated region body
PF: predicated region fallthrough
CT: control target
= control target key end

     0   :  { %s5548_s0 = inlined_call_operand.vmem [shape: f32[8,32], index: 0, kind: input, shape index: {}]   ;;  %s5549_s1 = inlined_call_operand.vmem [shape: f32[8,32], index: 1, kind: input, shape index: {}]   ;;  %s5550_s2 = inlined_call_operand.vmem [shape: s32[8,1], index: 2, kind: input, shape index: {}]   ;;  %s5551_s3 = inlined_call_operand.vmem [shape: f32[32,32], index: 3, kind: input, shape index: {}]   ;;  %s5552_s4 = inlined_call_operand.vmem [shape: f32[1,32], index: 4, kind: input, shape index: {}]   ;;  %s5553_s5 = inlined_call_operand.vmem [shape: f32[32,32], index: 5, kind: input, shape index: {}]   ;;  %s5554_s6 = inlined_call_operand.vmem [shape: f32[1,32], index: 6, kind: input, shape index: {}]   ;;  %s5555_s7 = inlined_call_operand.vmem [shape: f32[32,32], index: 7, kind: input, shape index: {}]   ;;  %s5556_s8 = inlined_call_operand.vmem [shape: f32[1,32], index: 8, kind: input, shape index: {}]   ;;  %s5557_s9 = inlined_call_operand.vmem [shape: f32[32,32], index: 9, kind: input, shape index: {}]   ;;  %s5558_s10 = inlined_call_operand.vmem [shape: f32[1,32], index: 10, kind: input, shape index: {}]   ;;  %s5559_s11 = inlined_call_operand.vmem [shape: bf16[32,512], index: 11, kind: input, shape index: {}]   ;;  %s5560_s12 = inlined_call_operand.vmem [shape: f32[8,512], index: 12, kind: input, shape index: {}]   ;;  %s5561_s13 = inlined_call_operand.vmem [shape: bf16[32,512], index: 13, kind: input, shape index: {}]   ;;  %s5562_s14 = inlined_call_operand.vmem [shape: f32[8,512], index: 14, kind: input, shape index: {}]   ;;  %s5563_s15 = inlined_call_operand.vmem [shape: f32[1,512], index: 15, kind: input, shape index: {}]   ;;  %s5564_s16 = inlined_call_operand.hbm [shape: bf16[512,512], index: 16, kind: input, shape index: {}]   ;;  %s5565_s17 = inlined_call_operand.vmem [shape: f32[1,512], index: 17, kind: input, shape index: {}]   ;;  %s5566_s18 = inlined_call_operand.vmem [shape: f32[512,1], index: 18, kind: input, shape index: {}]   ;;  %s5567_s19 = inlined_call_operand.<no memory space> [shape: f32[1,1], index: 19, kind: input, shape index: {}]   ;;  %s5568_s20 = inlined_call_operand.hbm [shape: f32[1,1], index: 20, kind: output, shape index: {}]  }
   0x1   :  { %5658 = sst [smem:[#allocation96_spill]] %s5548_s0  ;;  %v25_v0 = vstv %s5567_s19 }
   0x2   :  { %5659 = sst [smem:[#allocation97_spill]] %s5549_s1  ;;  %26 = vst [vmem:[#allocation2] sm:$0x1] %v25_v0 }
   0x3   :  { %5660 = sst [smem:[#allocation98_spill]] %s5550_s2 }
   0x4   :  { %5661 = sst [smem:[#allocation99_spill]] %s5551_s3 }
   0x5   :  { %5662 = sst [smem:[#allocation100_spill]] %s5552_s4 }
   0x6   :  { %27 = vsyncpa [#allocation4], 0 }
   0x7   :  { %28 = vsyncpa [#allocation5], 0  ;;  %s4102_s23 = smov [#allocation3]   ;;  %s4054_s3 = scalar_lea.hbm %s5564_s16, 16384 }
   0x8   :  { %s66_s24 = sshll.u32 %s4102_s23, 4  ;;  %p4055_p0 = scmp.ne.s32.totalorder %s5564_s16, %s4054_s3  ;;  %s67_s24 = int_to_ptr.vmem [resolvable:$true] %s66_s24 }
   0x9   :  { %p4058_p1 = scmp.lt.u32.totalorder %s4054_s3, %s5564_s16 }
   0xb   :  { %p4060_p2 = pnand %p4058_p1, %p4055_p0 }
   0xd   :  { %4063 = shalt.err (!%p4060_p2)
}
   0xe   :  { %s4064_s19 = scalar_lea.vmem %s67_s24, 16384  ;;  %p4069_p4 = scmp.lt.s32.totalorder %s67_s24, %s67_s24 }
   0xf   :  { %p4065_p3 = scmp.ne.s32.totalorder %s67_s24, %s4064_s19  ;;  %p4070_p5 = scmp.lt.s32.totalorder %s4064_s19, %s4064_s19 }
  0x11   :  { %p4071_p6 = por %p4070_p5, %p4069_p4 }
  0x13   :  { %p4072_p7 = pnand %p4071_p6, %p4065_p3 }
  0x15   :  { %4075 = shalt.err (!%p4072_p7)
}
  0x16   :  { %s4103_s29 = smov 256   ;;  %s4104_s30 = smov 16  }
  0x17   :  { %72 = dma.hbm_to_vmem [thread:$0]  %s5564_s16, 16384, %s67_s24, [#allocation4], %s4103_s29, %s4103_s29, %s4104_s30  }
  0x18   :  { %4098 = dma.done.wait [#allocation4], 16384  }
  0x19   :  { %4099 = vsyncadd [#allocation4], 4294950912  ;;  %s5663_s23 = sld [smem:[#allocation96_spill]]  ;;  %vm86_vm0 = vcmask 261120   ;;  %s5664_s3 = sld [smem:[#allocation97_spill]]  ;;  %v4105_v7 = vmov 0.0|0.0   ;;  %v5570_v52 = vlaneseq }
  0x1a   :  { %3595 = vmatprep.subr.bf16.mxu0 %v4105_v7  ;;  %3601 = vmatprep.subr.bf16.mxu1 %v4105_v7  ;;  %s5665_s26 = sld [smem:[#allocation99_spill]]  ;;  %vm4106_vm1 = vmmov 0   ;;  %v4107_v14 = vmov 0.0   ;;  %v178_v15 = vld [vmem:[%s5553_s5] sm:$0xff]  ;;  %v179_v16 = vld [vmem:[%s5553_s5 + $0x8] sm:$0xff]  ;;  %v271_v27 = vld [vmem:[%s5555_s7 + $0x10] sm:$0xff] }
  0x1b   :  { %3559 = vmatprep.mubr.msk.f32.mxu0 %vm4106_vm1, %v4107_v14  ;;  %3570 = vmatprep.mubr.msk.f32.mxu1 %vm4106_vm1, %v4107_v14  ;;  %v3602_v17 = vpack.c.bf16 %v179_v16, %v178_v15  ;;  %v269_v22 = vld [vmem:[%s5555_s7] sm:$0xff]  ;;  %v270_v23 = vld [vmem:[%s5555_s7 + $0x8] sm:$0xff]  ;;  %v272_v28 = vld [vmem:[%s5555_s7 + $0x18] sm:$0xff]  ;;  %s5666_s0 = sld [smem:[#allocation98_spill]]  ;;  %v4108_v36 = vmov 0   ;;  %s5667_s16 = sld [smem:[#allocation100_spill]] }
  0x1c   :  { %v3608_v25 = vpack.c.bf16 %v270_v23, %v269_v22  ;;  %v3611_v30 = vpack.c.bf16 %v272_v28, %v271_v27  ;;  %v180_v32 = vld [vmem:[%s5553_s5 + $0x10] sm:$0xff]  ;;  %v181_v33 = vld [vmem:[%s5553_s5 + $0x18] sm:$0xff]  ;;  %3832 = vset.pattern.permute.xlu1 %v4108_v36  ;;  %3833 = vset.pattern.permute.xlu0 %v4108_v36  ;;  %v448_v37 = vld [vmem:[%s5560_s12 + $0x8] sm:$0xff]  ;;  %v440_v58 = vand.u32 127, %v5570_v52  ;;  %vm451_vm2 = vcmask 64512  }
  0x1d   :  { %3603 = vmatpush3.bf16.msra.mxu1 %v3602_v17  ;;  %v3605_v34 = vpack.c.bf16 %v181_v33, %v180_v32  ;;  %v447_v38 = vld [vmem:[%s5560_s12] sm:$0xff]  ;;  %v598_v39 = vld [vmem:[%s5562_s14 + $0x8] sm:$0xff]  ;;  %v356_v48 = vld [vmem:[%s5557_s9 + $0x10] sm:$0xff]  ;;  %vm3181_vm4 = vcmask 0  }
  0x1e   :  { %3604 = vmatprep.subr.bf16.mxu1 %v4105_v7  ;;  %v354_v41 = vld [vmem:[%s5557_s9] sm:$0xff]  ;;  %v355_v42 = vld [vmem:[%s5557_s9 + $0x8] sm:$0xff]  ;;  %v357_v49 = vld [vmem:[%s5557_s9 + $0x18] sm:$0xff] }
  0x1f   :  { %v83_v1 = vld [vmem:[%s5663_s23] sm:$0xff]  ;;  %v3614_v46 = vpack.c.bf16 %v355_v42, %v354_v41  ;;  %v3617_v51 = vpack.c.bf16 %v357_v49, %v356_v48  ;;  %v450_v54 = vld [vmem:[%s5560_s12 + $0x18] sm:$0xff]  ;;  %v449_v59 = vld [vmem:[%s5560_s12 + $0x10] sm:$0xff] }
  0x20   :  { %v84_v2 = vld [vmem:[%s5664_s3] sm:$0xff]  ;;  %v85_v3 = vmul.f32 %v83_v1, %v83_v1  ;;  %v94_v9 = vld [vmem:[%s5665_s26 + $0x8] sm:$0xff]  ;;  %v95_v11 = vld [vmem:[%s5665_s26 + $0x10] sm:$0xff] }
  0x21   :  { %v262_v4 = vmul.f32 %v84_v2, %v84_v2  ;;  %v93_v8 = vld [vmem:[%s5665_s26] sm:$0xff]  ;;  %v96_v12 = vld [vmem:[%s5665_s26 + $0x18] sm:$0xff]  ;;  %3606 = vmatpush3.bf16.msra.mxu1 %v3605_v34  ;;  %v599_v0 = vld [vmem:[%s5562_s14 + $0x10] sm:$0xff] }
  0x22   :  { %v87_v5 = vsel %vm86_vm0, %v85_v3, 0.0  ;;  %v3596_v10 = vpack.c.bf16 %v94_v9, %v93_v8  ;;  %v3599_v13 = vpack.c.bf16 %v96_v12, %v95_v11  ;;  %3613 = vmatprep.subr.bf16.mxu1 %v4105_v7  ;;  %v438_v35 = vld [vmem:[%s5666_s0] sm:$0xff]  ;;  %v600_v60 = vld [vmem:[%s5562_s14 + $0x18] sm:$0xff] }
  0x23   :  { %88 = vadd.xlane.f32.xlu0 %v87_v5  ;;  %v263_v6 = vsel %vm86_vm0, %v262_v4, 0.0  ;;  %442 = vperm.xlu1 %3832, %v438_v35   ;;  %v3198_v40 = vld [vmem:[%s5667_s16] ss:$0 sm:$0xff]  ;;  %v3837_v4 = vld [vmem:[%s5559_s11 + $0x8] ss:$16 sps:$4 sm:$0xff]  }
  0x24   :  { %3597 = vmatpush3.bf16.msra.mxu0 %v3596_v10  ;;  %v3202_v50 = vld [vmem:[%s5556_s8] ss:$0 sm:$0xff]  ;;  %v3842_v5 = vld [vmem:[%s5559_s11 + $0x24] ss:$16 sps:$4 sm:$0xff]   ;;  %v3843_v8 = vld [vmem:[%s5559_s11 + $0x28] ss:$16 sps:$4 sm:$0xff]  }
  0x25   :  { %3598 = vmatprep.subr.bf16.mxu0 %v4105_v7  ;;  %v597_v62 = vld [vmem:[%s5562_s14] sm:$0xff]  ;;  %v3851_v10 = vld [vmem:[%s5561_s13 + $0xc] ss:$16 sps:$4 sm:$0xff]   ;;  %v3849_v16 = vld [vmem:[%s5561_s13 + $0x8] ss:$16 sps:$4 sm:$0xff]  }
  0x26   :  { %v3834_v3 = vld [vmem:[%s5559_s11] ss:$16 sps:$4 sm:$0xff]   ;;  %v3848_v9 = vld [vmem:[%s5561_s13 + $0x4] ss:$16 sps:$4 sm:$0xff]   ;;  %v3855_v22 = vld [vmem:[%s5561_s13 + $0x28] ss:$16 sps:$4 sm:$0xff]  }
  0x27   :  { %264 = vadd.xlane.f32.xlu0 %v263_v6  ;;  %v3845_v6 = vld [vmem:[%s5559_s11 + $0x2c] ss:$16 sps:$4 sm:$0xff]   ;;  %v3200_v11 = vld [vmem:[%s5554_s6] ss:$0 sm:$0xff]  ;;  %v4410_v23 = vld [vmem:[#allocation3 + $0x4] ss:$16 sps:$4 sm:$0xff]  }
  0x28   :  { %3600 = vmatpush3.bf16.msra.mxu0 %v3599_v13  ;;  %v3846_v15 = vld [vmem:[%s5561_s13] ss:$16 sps:$4 sm:$0xff]   ;;  %v4592_v52 = vld [vmem:[#allocation3 + $0x1a8] ss:$16 sps:$4 sm:$0xff]  }
  0x29   :  { %3607 = vmatprep.subr.bf16.mxu0 %v4105_v7  ;;  %v4416_v28 = vld [vmem:[#allocation3] ss:$16 sps:$4 sm:$0xff]   ;;  %v4424_v32 = vld [vmem:[#allocation3 + $0x2c] ss:$16 sps:$4 sm:$0xff]   ;;  %5699 = vst [vmem:[#allocation40_spill] sm:$0xff] %v4592_v52 }
  0x2a   :  { %v4466_v48 = vld [vmem:[#allocation3 + $0x6c] ss:$16 sps:$4 sm:$0xff]   ;;  %v4470_v49 = vld [vmem:[#allocation3 + $0x60] ss:$16 sps:$4 sm:$0xff]  }
  0xa2   :  { %v443_v61 = vpop.permute.xlu1 %442 }
  0xa3   :  { %vm444_vm3 = vcmp.eq.s32.totalorder %v440_v58, %v443_v61  ;;  %v4494_v58 = vld [vmem:[#allocation3 + $0xa0] ss:$16 sps:$4 sm:$0xff]   ;;  %v4502_v61 = vld [vmem:[#allocation3 + $0xcc] ss:$16 sps:$4 sm:$0xff]  }
  0xa4   :  { %v3206_v63 = vsel %vm444_vm3, 1.0, %v4107_v14  ;;  %5669 = vst [vmem:[#allocation10_spill] sm:$0xff] %v4502_v61 }
  0xb0   :  { %v89_v18 = vpop.xlane.xlu0 %88 }
  0xb1   :  { %v90_v19 = vmax.f32 %v89_v18, 1e-24  ;;  %v3854_v18 = vld [vmem:[%s5561_s13 + $0x24] ss:$16 sps:$4 sm:$0xff]  }
  0xb3   :  { %4050 = vrsqrt.f32 %v90_v19  ;;  %v3857_v19 = vld [vmem:[%s5561_s13 + $0x2c] ss:$16 sps:$4 sm:$0xff]  }
  0xb4   :  { %v265_v20 = vpop.xlane.xlu0 %264 }
  0xb5   :  { %v266_v21 = vmax.f32 %v265_v20, 1e-24  ;;  %v3204_v20 = vld [vmem:[%s5558_s10] ss:$0 sm:$0xff] }
  0xb7   :  { %4052 = vrsqrt.f32 %v266_v21  ;;  %v3852_v21 = vld [vmem:[%s5561_s13 + $0x20] ss:$16 sps:$4 sm:$0xff]  }
  0xbd   :  { %v4051_v24 = vpop.eup %4050 }
  0xbe   :  { %v92_v26 = vmul.f32 %v4051_v24, %v83_v1  ;;  %v3836_v1 = vld [vmem:[%s5559_s11 + $0x4] ss:$16 sps:$4 sm:$0xff]   ;;  %v4412_v24 = vld [vmem:[#allocation3 + $0xc] ss:$16 sps:$4 sm:$0xff]  }
  0xc0   :  { %3560 = vmatmul.mubr.msk.f32.vlgmr.msra.gmra.mrb[0].mxu0 %vm86_vm0, %v92_v26 }
  0xc1   :  { %v4053_v29 = vpop.eup %4052  ;;  %3609 = vmatpush3.bf16.msra.mxu0 %v3608_v25  ;;  %3581 = vmatprep.mubr.msk.f32.mxu0 %vm4106_vm1, %v4107_v14 }
  0xc2   :  { %3610 = vmatprep.subr.bf16.mxu0 %v4105_v7  ;;  %v268_v31 = vmul.f32 %v4053_v29, %v84_v2  ;;  %v3839_v2 = vld [vmem:[%s5559_s11 + $0xc] ss:$16 sps:$4 sm:$0xff]  }
  0xc3   :  { %v4418_v29 = vld [vmem:[#allocation3 + $0x8] ss:$16 sps:$4 sm:$0xff]  }
  0xc5   :  { %3612 = vmatpush3.bf16.msra.mxu0 %v3611_v30 }
  0xc6   :  { %455 = vmatprep.subr.mxu0 %v448_v37  ;;  %v4438_v37 = vld [vmem:[#allocation3 + $0x20] ss:$16 sps:$4 sm:$0xff]  }
  0xc8   :  { %3582 = vmatmul.mubr.msk.f32.vlgmr.msra.gmra.mrb[2].mxu0 %vm86_vm0, %v268_v31  ;;  %v4422_v31 = vld [vmem:[#allocation3 + $0x24] ss:$16 sps:$4 sm:$0xff]  }
  0xc9   :  { %519 = vmatprep.mubr.f32.mxu0 %v4107_v14  ;;  %456 = vmatpush1.msra.mxu0 %v447_v38  ;;  %v4440_v38 = vld [vmem:[#allocation3 + $0x28] ss:$16 sps:$4 sm:$0xff]  }
  0xca   :  { %601 = vmatprep.subr.mxu0 %v598_v39  ;;  %v4444_v39 = vld [vmem:[#allocation3 + $0x44] ss:$16 sps:$4 sm:$0xff]  }
  0xcc   :  { %3207 = vmatmul.mubr.msk.f32.vlgmr.msra.gmra.mrb[4].mxu0 %vm451_vm2, %v3206_v63 }
  0xcd   :  { %602 = vmatpush1.msra.mxu0 %v597_v62  ;;  %665 = vmatprep.mubr.f32.mxu0 %v4107_v14  ;;  %v4506_v62 = vld [vmem:[#allocation3 + $0xc0] ss:$16 sps:$4 sm:$0xff]  }
  0xce   :  { %795 = vmatprep.subr.bf16.mxu0 %v3836_v1  ;;  %5670 = vst [vmem:[#allocation11_spill] sm:$0xff] %v4506_v62  ;;  %v4514_v1 = vld [vmem:[#allocation3 + $0xec] ss:$16 sps:$4 sm:$0xff]  }
  0xcf   :  { %5673 = vst [vmem:[#allocation14_spill] sm:$0xff] %v4514_v1 }
  0xd0   :  { %3209 = vmatmul.mubr.msk.f32.vlgmr.msra.gmra.mrb[6].mxu0 %vm451_vm2, %v3206_v63 }
  0xd1   :  { %796 = vmatpush1.bf16.msra.mxu0 %v3834_v3  ;;  %827 = vmatprep.mubr.bf16.mxu0 %v4108_v36  ;;  %v4520_v3 = vld [vmem:[#allocation3 + $0xe8] ss:$16 sps:$4 sm:$0xff]  }
  0xd2   :  { %797 = vmatprep.subr.bf16.mxu0 %v3842_v5  ;;  %5675 = vst [vmem:[#allocation16_spill] sm:$0xff] %v4520_v3  ;;  %v4526_v5 = vld [vmem:[#allocation3 + $0x10c] ss:$16 sps:$4 sm:$0xff]  }
  0xd3   :  { %5677 = vst [vmem:[#allocation18_spill] sm:$0xff] %v4526_v5 }
 0x193   :  { %v173_v43 = vpop.f32.mrb[0].mxu0 }
 0x194   :  { %v174_v44 = vadd.f32 %v3198_v40, %v173_v43  ;;  %v3561_v45 = vpop.f32.mrb[1].mxu0  ;;  %v4446_v40 = vld [vmem:[#allocation3 + $0x4c] ss:$16 sps:$4 sm:$0xff]  }
 0x195   :  { %v4458_v45 = vld [vmem:[#allocation3 + $0x40] ss:$16 sps:$4 sm:$0xff]  }
 0x196   :  { %v177_v47 = vmax.f32 %v174_v44, 0.0 }
 0x198   :  { %3571 = vmatmul.mubr.msk.f32.vlgmr.msra.gmra.mrb[0].mxu1 %vm86_vm0, %v177_v47  ;;  %v4464_v47 = vld [vmem:[#allocation3 + $0x64] ss:$16 sps:$4 sm:$0xff]  }
 0x199   :  { %3615 = vmatpush3.bf16.msra.mxu1 %v3614_v46  ;;  %3592 = vmatprep.mubr.msk.f32.mxu1 %vm4106_vm1, %v4107_v14  ;;  %v4460_v46 = vld [vmem:[#allocation3 + $0x48] ss:$16 sps:$4 sm:$0xff]  }
 0x19a   :  { %3616 = vmatprep.subr.bf16.mxu1 %v4105_v7  ;;  %v3840_v7 = vld [vmem:[%s5559_s11 + $0x20] ss:$16 sps:$4 sm:$0xff]  }
 0x19b   :  { %v349_v53 = vpop.f32.mrb[2].mxu0  ;;  %798 = vmatpush1.bf16.msra.mxu0 %v3840_v7  ;;  %v4532_v7 = vld [vmem:[#allocation3 + $0x108] ss:$16 sps:$4 sm:$0xff]  }
 0x19c   :  { %v350_v55 = vadd.f32 %v3202_v50, %v349_v53  ;;  %v3583_v56 = vpop.f32.mrb[3].mxu0  ;;  %929 = vmatprep.subr.bf16.mxu0 %v3848_v9  ;;  %v4472_v50 = vld [vmem:[#allocation3 + $0x68] ss:$16 sps:$4 sm:$0xff]   ;;  %v4478_v53 = vld [vmem:[#allocation3 + $0x8c] ss:$16 sps:$4 sm:$0xff]   ;;  %5679 = vst [vmem:[#allocation20_spill] sm:$0xff] %v4532_v7 }
 0x19d   :  { %3618 = vmatpush3.bf16.msra.mxu1 %v3617_v51  ;;  %v4476_v51 = vld [vmem:[#allocation3 + $0x84] ss:$16 sps:$4 sm:$0xff]   ;;  %v4538_v9 = vld [vmem:[#allocation3 + $0x12c] ss:$16 sps:$4 sm:$0xff]  }
 0x19e   :  { %v353_v57 = vmax.f32 %v350_v55, 0.0  ;;  %526 = vmatprep.subr.mxu1 %v450_v54  ;;  %v4482_v54 = vld [vmem:[#allocation3 + $0x80] ss:$16 sps:$4 sm:$0xff]   ;;  %v4484_v55 = vld [vmem:[#allocation3 + $0x88] ss:$16 sps:$4 sm:$0xff]   ;;  %5681 = vst [vmem:[#allocation22_spill] sm:$0xff] %v4538_v9 }
 0x19f   :  { %v4426_v33 = vpop.f32.mrb[4].mxu0  ;;  %v4488_v56 = vld [vmem:[#allocation3 + $0xa4] ss:$16 sps:$4 sm:$0xff]  }
 0x1a0   :  { %3593 = vmatmul.mubr.msk.f32.vlgmr.msra.gmra.mrb[2].mxu1 %vm86_vm0, %v353_v57  ;;  %v4432_v35 = vpop.f32.mrb[5].mxu0  ;;  %v4490_v57 = vld [vmem:[#allocation3 + $0xac] ss:$16 sps:$4 sm:$0xff]  }
 0x1a1   :  { %527 = vmatpush1.msra.mxu1 %v449_v59  ;;  %590 = vmatprep.mubr.f32.mxu1 %v4107_v14  ;;  %v4496_v59 = vld [vmem:[#allocation3 + $0xa8] ss:$16 sps:$4 sm:$0xff]  }
 0x1a2   :  { %672 = vmatprep.subr.mxu1 %v600_v60  ;;  %v4500_v60 = vld [vmem:[#allocation3 + $0xc4] ss:$16 sps:$4 sm:$0xff]  }
 0x1a3   :  { %v4448_v41 = vpop.f32.mrb[6].mxu0  ;;  %5668 = vst [vmem:[#allocation9_spill] sm:$0xff] %v4500_v60 }
 0x1a4   :  { %3208 = vmatmul.mubr.msk.f32.vlgmr.msra.gmra.mrb[4].mxu1 %vm451_vm2, %v3206_v63  ;;  %v4452_v43 = vpop.f32.mrb[7].mxu0 }
 0x1a5   :  { %673 = vmatpush1.msra.mxu1 %v599_v0  ;;  %736 = vmatprep.mubr.f32.mxu1 %v4107_v14  ;;  %v4512_v0 = vld [vmem:[#allocation3 + $0xe4] ss:$16 sps:$4 sm:$0xff]  }
 0x1a6   :  { %836 = vmatprep.subr.bf16.mxu1 %v3839_v2  ;;  %5672 = vst [vmem:[#allocation13_spill] sm:$0xff] %v4512_v0  ;;  %v4518_v2 = vld [vmem:[#allocation3 + $0xe0] ss:$16 sps:$4 sm:$0xff]  }
 0x1a7   :  { %5674 = vst [vmem:[#allocation15_spill] sm:$0xff] %v4518_v2 }
 0x1a8   :  { %3210 = vmatmul.mubr.msk.f32.vlgmr.msra.gmra.mrb[6].mxu1 %vm451_vm2, %v3206_v63  ;;  %v4508_v63 = vld [vmem:[#allocation3 + $0xc8] ss:$16 sps:$4 sm:$0xff]  }
 0x1a9   :  { %837 = vmatpush1.bf16.msra.mxu1 %v3837_v4  ;;  %868 = vmatprep.mubr.bf16.mxu1 %v4108_v36  ;;  %5671 = vst [vmem:[#allocation12_spill] sm:$0xff] %v4508_v63  ;;  %v4524_v4 = vld [vmem:[#allocation3 + $0x104] ss:$16 sps:$4 sm:$0xff]  }
 0x1aa   :  { %838 = vmatprep.subr.bf16.mxu1 %v3845_v6  ;;  %5676 = vst [vmem:[#allocation17_spill] sm:$0xff] %v4524_v4  ;;  %v4530_v6 = vld [vmem:[#allocation3 + $0x100] ss:$16 sps:$4 sm:$0xff]  }
 0x1ab   :  { %5678 = vst [vmem:[#allocation19_spill] sm:$0xff] %v4530_v6 }
 0x1ad   :  { %839 = vmatpush1.bf16.msra.mxu1 %v3843_v8  ;;  %v4536_v8 = vld [vmem:[#allocation3 + $0x124] ss:$16 sps:$4 sm:$0xff]  }
 0x1ae   :  { %970 = vmatprep.subr.bf16.mxu1 %v3851_v10  ;;  %5680 = vst [vmem:[#allocation21_spill] sm:$0xff] %v4536_v8  ;;  %v4542_v10 = vld [vmem:[#allocation3 + $0x120] ss:$16 sps:$4 sm:$0xff]  }
 0x1af   :  { %5682 = vst [vmem:[#allocation23_spill] sm:$0xff] %v4542_v10 }
 0x26b   :  { %v258_v12 = vpop.f32.mrb[0].mxu1 }
 0x26c   :  { %v259_v13 = vadd.f32 %v3200_v11, %v258_v12  ;;  %v3572_v14 = vpop.f32.mrb[1].mxu1  ;;  %v4544_v11 = vld [vmem:[#allocation3 + $0x128] ss:$16 sps:$4 sm:$0xff]   ;;  %v4548_v12 = vld [vmem:[#allocation3 + $0x144] ss:$16 sps:$4 sm:$0xff]  }
 0x26d   :  { %5683 = vst [vmem:[#allocation24_spill] sm:$0xff] %v4544_v11  ;;  %5684 = vst [vmem:[#allocation25_spill] sm:$0xff] %v4548_v12  ;;  %v4554_v14 = vld [vmem:[#allocation3 + $0x140] ss:$16 sps:$4 sm:$0xff]  }
 0x26e   :  { %v743_v17 = vpack.c.bf16 %v259_v13, %v259_v13  ;;  %v4550_v13 = vld [vmem:[#allocation3 + $0x14c] ss:$16 sps:$4 sm:$0xff]   ;;  %5686 = vst [vmem:[#allocation27_spill] sm:$0xff] %v4554_v14 }
 0x26f   :  { %5685 = vst [vmem:[#allocation26_spill] sm:$0xff] %v4550_v13 }
 0x270   :  { %3219 = vmatmul.mubr.msk.bf16.vlgmr.msra.gmra.mrb[8].mxu0 %vm86_vm0, %v743_v17  ;;  %3220 = vmatmul.mubr.msk.bf16.vlgmr.msra.gmra.mrb[8].mxu1 %vm86_vm0, %v743_v17  ;;  %v4564_v17 = vld [vmem:[#allocation3 + $0x16c] ss:$16 sps:$4 sm:$0xff]  }
 0x271   :  { %930 = vmatpush1.bf16.msra.mxu0 %v3846_v15  ;;  %971 = vmatpush1.bf16.msra.mxu1 %v3849_v16  ;;  %v4556_v15 = vld [vmem:[#allocation3 + $0x148] ss:$16 sps:$4 sm:$0xff]   ;;  %v4562_v16 = vld [vmem:[#allocation3 + $0x164] ss:$16 sps:$4 sm:$0xff]   ;;  %5689 = vst [vmem:[#allocation30_spill] sm:$0xff] %v4564_v17 }
 0x272   :  { %931 = vmatprep.subr.bf16.mxu0 %v3854_v18  ;;  %972 = vmatprep.subr.bf16.mxu1 %v3857_v19  ;;  %5687 = vst [vmem:[#allocation28_spill] sm:$0xff] %v4556_v15  ;;  %5688 = vst [vmem:[#allocation29_spill] sm:$0xff] %v4562_v16  ;;  %v4566_v18 = vld [vmem:[#allocation3 + $0x160] ss:$16 sps:$4 sm:$0xff]   ;;  %v4568_v19 = vld [vmem:[#allocation3 + $0x168] ss:$16 sps:$4 sm:$0xff]  }
 0x273   :  { %v434_v25 = vpop.f32.mrb[2].mxu1  ;;  %961 = vmatprep.mubr.bf16.mxu0 %v4108_v36  ;;  %1002 = vmatprep.mubr.bf16.mxu1 %v4108_v36  ;;  %5690 = vst [vmem:[#allocation31_spill] sm:$0xff] %v4566_v18  ;;  %5691 = vst [vmem:[#allocation32_spill] sm:$0xff] %v4568_v19 }
 0x274   :  { %v435_v26 = vadd.f32 %v3204_v20, %v434_v25  ;;  %v3594_v27 = vpop.f32.mrb[3].mxu1  ;;  %v4574_v20 = vld [vmem:[#allocation3 + $0x180] ss:$16 sps:$4 sm:$0xff]   ;;  %v4580_v25 = vld [vmem:[#allocation3 + $0x18c] ss:$16 sps:$4 sm:$0xff]  }
 0x275   :  { %932 = vmatpush1.bf16.msra.mxu0 %v3852_v21  ;;  %973 = vmatpush1.bf16.msra.mxu1 %v3855_v22  ;;  %5692 = vst [vmem:[#allocation33_spill] sm:$0xff] %v4574_v20  ;;  %v4576_v21 = vld [vmem:[#allocation3 + $0x184] ss:$16 sps:$4 sm:$0xff]   ;;  %v4578_v22 = vld [vmem:[#allocation3 + $0x188] ss:$16 sps:$4 sm:$0xff]   ;;  %5695 = vst [vmem:[#allocation36_spill] sm:$0xff] %v4580_v25 }
 0x276   :  { %v877_v30 = vpack.c.bf16 %v435_v26, %v435_v26  ;;  %1904 = vmatprep.subr.bf16.mxu0 %v4410_v23  ;;  %1986 = vmatprep.subr.bf16.mxu1 %v4412_v24  ;;  %5693 = vst [vmem:[#allocation34_spill] sm:$0xff] %v4576_v21  ;;  %5694 = vst [vmem:[#allocation35_spill] sm:$0xff] %v4578_v22  ;;  %v4586_v26 = vld [vmem:[#allocation3 + $0x1a4] ss:$16 sps:$4 sm:$0xff]   ;;  %v4588_v27 = vld [vmem:[#allocation3 + $0x1ac] ss:$16 sps:$4 sm:$0xff]  }
 0x277   :  { %v4428_v34 = vpop.f32.mrb[4].mxu1  ;;  %5696 = vst [vmem:[#allocation37_spill] sm:$0xff] %v4586_v26  ;;  %5697 = vst [vmem:[#allocation38_spill] sm:$0xff] %v4588_v27 }
 0x278   :  { %3229 = vmatmul.mubr.msk.bf16.vlgmr.msra.gmra.mrb[12].mxu0 %vm86_vm0, %v877_v30  ;;  %3230 = vmatmul.mubr.msk.bf16.vlgmr.msra.gmra.mrb[12].mxu1 %vm86_vm0, %v877_v30  ;;  %v4434_v36 = vpop.f32.mrb[5].mxu1  ;;  %v4590_v30 = vld [vmem:[#allocation3 + $0x1a0] ss:$16 sps:$4 sm:$0xff]  }
 0x279   :  { %1905 = vmatpush1.bf16.msra.mxu0 %v4416_v28  ;;  %1987 = vmatpush1.bf16.msra.mxu1 %v4418_v29  ;;  %5698 = vst [vmem:[#allocation39_spill] sm:$0xff] %v4590_v30 }
 0x27a   :  { %1906 = vmatprep.subr.bf16.mxu0 %v4422_v31  ;;  %1988 = vmatprep.subr.bf16.mxu1 %v4424_v32 }
 0x27b   :  { %v4450_v42 = vpop.f32.mrb[6].mxu1 }
 0x27c   :  { %v4454_v44 = vpop.f32.mrb[7].mxu1 }
 0x27d   :  { %1907 = vmatpush1.bf16.msra.mxu0 %v4438_v37  ;;  %1989 = vmatpush1.bf16.msra.mxu1 %v4440_v38 }
 0x27e   :  { %1908 = vmatprep.subr.bf16.mxu0 %v4444_v39  ;;  %1990 = vmatprep.subr.bf16.mxu1 %v4446_v40 }
 0x281   :  { %1909 = vmatpush1.bf16.msra.mxu0 %v4458_v45  ;;  %1991 = vmatpush1.bf16.msra.mxu1 %v4460_v46 }
 0x282   :  { %1910 = vmatprep.subr.bf16.mxu0 %v4464_v47  ;;  %1992 = vmatprep.subr.bf16.mxu1 %v4466_v48 }
 0x285   :  { %1911 = vmatpush1.bf16.msra.mxu0 %v4470_v49  ;;  %1993 = vmatpush1.bf16.msra.mxu1 %v4472_v50 }
 0x286   :  { %1912 = vmatprep.subr.bf16.mxu0 %v4476_v51  ;;  %1994 = vmatprep.subr.bf16.mxu1 %v4478_v53 }
 0x289   :  { %1913 = vmatpush1.bf16.msra.mxu0 %v4482_v54  ;;  %1995 = vmatpush1.bf16.msra.mxu1 %v4484_v55 }
 0x28a   :  { %1914 = vmatprep.subr.bf16.mxu0 %v4488_v56  ;;  %1996 = vmatprep.subr.bf16.mxu1 %v4490_v57 }
 0x28d   :  { %1915 = vmatpush1.bf16.msra.mxu0 %v4494_v58  ;;  %1997 = vmatpush1.bf16.msra.mxu1 %v4496_v59 }
 0x28e   :  { %1916 = vmatprep.subr.bf16.mxu0 %v4500_v60  ;;  %1998 = vmatprep.subr.bf16.mxu1 %v4502_v61 }
 0x291   :  { %1917 = vmatpush1.bf16.msra.mxu0 %v4506_v62  ;;  %1999 = vmatpush1.bf16.msra.mxu1 %v4508_v63 }
 0x292   :  { %1918 = vmatprep.subr.bf16.mxu0 %v4512_v0  ;;  %2000 = vmatprep.subr.bf16.mxu1 %v4514_v1 }
 0x295   :  { %1919 = vmatpush1.bf16.msra.mxu0 %v4518_v2  ;;  %2001 = vmatpush1.bf16.msra.mxu1 %v4520_v3 }
 0x296   :  { %1920 = vmatprep.subr.bf16.mxu0 %v4524_v4  ;;  %2002 = vmatprep.subr.bf16.mxu1 %v4526_v5 }
 0x299   :  { %1921 = vmatpush1.bf16.msra.mxu0 %v4530_v6  ;;  %2003 = vmatpush1.bf16.msra.mxu1 %v4532_v7 }
 0x29a   :  { %1922 = vmatprep.subr.bf16.mxu0 %v4536_v8  ;;  %2004 = vmatprep.subr.bf16.mxu1 %v4538_v9 }
 0x29d   :  { %1923 = vmatpush1.bf16.msra.mxu0 %v4542_v10  ;;  %2005 = vmatpush1.bf16.msra.mxu1 %v4544_v11 }
 0x29e   :  { %1924 = vmatprep.subr.bf16.mxu0 %v4548_v12  ;;  %2006 = vmatprep.subr.bf16.mxu1 %v4550_v13 }
 0x2a1   :  { %1925 = vmatpush1.bf16.msra.mxu0 %v4554_v14  ;;  %2007 = vmatpush1.bf16.msra.mxu1 %v4556_v15 }
 0x2a2   :  { %1926 = vmatprep.subr.bf16.mxu0 %v4562_v16  ;;  %2008 = vmatprep.subr.bf16.mxu1 %v4564_v17 }
 0x2a5   :  { %1927 = vmatpush1.bf16.msra.mxu0 %v4566_v18  ;;  %2009 = vmatpush1.bf16.msra.mxu1 %v4568_v19 }
 0x2a6   :  { %1928 = vmatprep.subr.bf16.mxu0 %v4576_v21  ;;  %2010 = vmatprep.subr.bf16.mxu1 %v4580_v25  ;;  %v4598_v25 = vld [vmem:[#allocation3 + $0x1c4] ss:$16 sps:$4 sm:$0xff]   ;;  %v4604_v21 = vld [vmem:[#allocation3 + $0x1c8] ss:$16 sps:$4 sm:$0xff]  }
 0x2a7   :  { %5700 = vst [vmem:[#allocation41_spill] sm:$0xff] %v4598_v25  ;;  %5703 = vst [vmem:[#allocation44_spill] sm:$0xff] %v4604_v21 }
 0x2a9   :  { %1929 = vmatpush1.bf16.msra.mxu0 %v4574_v20  ;;  %2011 = vmatpush1.bf16.msra.mxu1 %v4578_v22  ;;  %v4600_v20 = vld [vmem:[#allocation3 + $0x1cc] ss:$16 sps:$4 sm:$0xff]   ;;  %v4602_v22 = vld [vmem:[#allocation3 + $0x1c0] ss:$16 sps:$4 sm:$0xff]  }
 0x2aa   :  { %1930 = vmatprep.subr.bf16.mxu0 %v4586_v26  ;;  %2012 = vmatprep.subr.bf16.mxu1 %v4588_v27  ;;  %5701 = vst [vmem:[#allocation42_spill] sm:$0xff] %v4600_v20  ;;  %5702 = vst [vmem:[#allocation43_spill] sm:$0xff] %v4602_v22  ;;  %v4610_v27 = vld [vmem:[#allocation3 + $0x1e4] ss:$16 sps:$4 sm:$0xff]   ;;  %v4616_v26 = vld [vmem:[#allocation3 + $0x1e8] ss:$16 sps:$4 sm:$0xff]  }
 0x2ab   :  { %5704 = vst [vmem:[#allocation45_spill] sm:$0xff] %v4610_v27  ;;  %5707 = vst [vmem:[#allocation48_spill] sm:$0xff] %v4616_v26 }
 0x2ad   :  { %1931 = vmatpush1.bf16.msra.mxu0 %v4590_v30  ;;  %2013 = vmatpush1.bf16.msra.mxu1 %v4592_v52  ;;  %v4612_v30 = vld [vmem:[#allocation3 + $0x1ec] ss:$16 sps:$4 sm:$0xff]   ;;  %v4614_v52 = vld [vmem:[#allocation3 + $0x1e0] ss:$16 sps:$4 sm:$0xff]  }
 0x2ae   :  { %1932 = vmatprep.subr.bf16.mxu0 %v4598_v25  ;;  %2014 = vmatprep.subr.bf16.mxu1 %v4600_v20  ;;  %5705 = vst [vmem:[#allocation46_spill] sm:$0xff] %v4612_v30  ;;  %5706 = vst [vmem:[#allocation47_spill] sm:$0xff] %v4614_v52  ;;  %v4622_v20 = vld [vmem:[#allocation3 + $0x204] ss:$16 sps:$4 sm:$0xff]  }
 0x2af   :  { %5708 = vst [vmem:[#allocation49_spill] sm:$0xff] %v4622_v20 }
 0x2b1   :  { %1933 = vmatpush1.bf16.msra.mxu0 %v4602_v22  ;;  %2015 = vmatpush1.bf16.msra.mxu1 %v4604_v21  ;;  %v4624_v22 = vld [vmem:[#allocation3 + $0x20c] ss:$16 sps:$4 sm:$0xff]   ;;  %v5710_v21 = vlaneseq }
 0x2b2   :  { %1934 = vmatprep.subr.bf16.mxu0 %v4610_v27  ;;  %2016 = vmatprep.subr.bf16.mxu1 %v4612_v30  ;;  %5709 = vst [vmem:[#allocation50_spill] sm:$0xff] %v4624_v22 }
 0x2b3   :  { %v1014_v25 = vshrl.u32 %v5710_v21, 7 }
 0x2b5   :  { %1935 = vmatpush1.bf16.msra.mxu0 %v4614_v52  ;;  %2017 = vmatpush1.bf16.msra.mxu1 %v4616_v26  ;;  %v4641_v15 = vsub.s32 0, %v1014_v25  ;;  %v4643_v21 = vsub.s32 2, %v1014_v25 }
 0x2b6   :  { %1945 = vmatprep.subr.bf16.mxu0 %v4622_v20  ;;  %2027 = vmatprep.subr.bf16.mxu1 %v4624_v22 }
 0x2b7   :  { %5711 = vst [vmem:[#allocation51_spill] sm:$0xff] %v4641_v15  ;;  %5712 = vst [vmem:[#allocation52_spill] sm:$0xff] %v4643_v21 }
 0x343   :  { %v829_v19 = vpop.f32.mrb[8].mxu0  ;;  %v870_v18 = vpop.f32.mrb[8].mxu1 }
 0x344   :  { %v4630_v27 = vadd.f32 %v829_v19, %v4426_v33  ;;  %v4633_v30 = vadd.f32 %v870_v18, %v4428_v34  ;;  %v831_v52 = vpop.f32.mrb[9].mxu0  ;;  %v872_v26 = vpop.f32.mrb[9].mxu1  ;;  %v4645_v19 = vsub.s32 1, %v1014_v25  ;;  %v4647_v34 = vsub.s32 3, %v1014_v25 }
 0x345   :  { %v4636_v17 = vadd.f32 %v831_v52, %v4432_v35  ;;  %v4639_v16 = vadd.f32 %v872_v26, %v4434_v36  ;;  %v833_v20 = vpop.f32.mrb[10].mxu0  ;;  %v874_v22 = vpop.f32.mrb[10].mxu1  ;;  %v4109_v18 = vmov 1966171168   ;;  %v1011_v52 = vld [vmem:[%s5563_s15] sm:$0xf] }
 0x346   :  { %v834_v14 = vpop.f32.mrb[11].mxu0  ;;  %v875_v33 = vpop.f32.mrb[11].mxu1  ;;  %5713 = vst [vmem:[#allocation53_spill] sm:$0xff] %v4645_v19  ;;  %5714 = vst [vmem:[#allocation54_spill] sm:$0xff] %v4647_v34  ;;  %v2105_v13 = vunpack.c.l.s4 %v4109_v18  ;;  %v1016_v35 = vrot.slane %v1011_v52, %v4641_v15  ;;  %v1024_v36 = vrot.slane %v1011_v52, %v4643_v21 }
 0x347   :  { %v1020_v14 = vrot.slane %v1011_v52, %v4645_v19  ;;  %v1028_v33 = vrot.slane %v1011_v52, %v4647_v34 }
 0x348   :  { %v2106_v20 = vunpack.c.0.s8 %v2105_v13 }
 0x34a   :  { %v2109_v2 = vsub.s32 %v2106_v20, %v1014_v25  ;;  %v4666_v20 = vld [vmem:[#allocation3 + $0x200] ss:$16 sps:$4 sm:$0xff]  }
 0x34b   :  { %v963_v22 = vpop.f32.mrb[12].mxu0  ;;  %v1004_v26 = vpop.f32.mrb[12].mxu1  ;;  %5715 = vst [vmem:[#allocation55_spill] sm:$0xff] %v4666_v20 }
 0x34c   :  { %v964_v12 = vadd.f32 %v963_v22, %v4448_v41  ;;  %v1005_v11 = vadd.f32 %v1004_v26, %v4450_v42  ;;  %v965_v18 = vpop.f32.mrb[13].mxu0  ;;  %v1006_v10 = vpop.f32.mrb[13].mxu1 }
 0x34d   :  { %v966_v9 = vadd.f32 %v965_v18, %v4452_v43  ;;  %v1007_v8 = vadd.f32 %v1006_v10, %v4454_v44  ;;  %v967_v7 = vpop.f32.mrb[14].mxu0  ;;  %v1008_v6 = vpop.f32.mrb[14].mxu1 }
 0x34e   :  { %v1033_v5 = vadd.f32 %v1016_v35, %v964_v12  ;;  %v1035_v13 = vadd.f32 %v1024_v36, %v1005_v11  ;;  %v968_v4 = vpop.f32.mrb[15].mxu0  ;;  %v1009_v3 = vpop.f32.mrb[15].mxu1 }
 0x34f   :  { %v1034_v1 = vadd.f32 %v1020_v14, %v966_v9  ;;  %v1036_v0 = vadd.f32 %v1028_v33, %v1007_v8 }
 0x350   :  { %v1231_v52 = vadd.f32 %v1033_v5, %v4630_v27  ;;  %v4662_v41 = vadd.f32 %v1035_v13, %v4633_v30 }
 0x351   :  { %v2100_v42 = vcombine.low %v1033_v5, %v1034_v1  ;;  %v2101_v22 = vcombine.high %v1033_v5, %v1034_v1  ;;  %v2102_v26 = vcombine.low %v1035_v13, %v1036_v0  ;;  %v2103_v43 = vcombine.high %v1035_v13, %v1036_v0  ;;  %v4668_v5 = vld [vmem:[#allocation3 + $0x208] ss:$16 sps:$4 sm:$0xff]  }
 0x352   :  { %v1235_v18 = vmax.f32 %v1231_v52, 0.0  ;;  %v1232_v44 = vadd.f32 %v1034_v1, %v4636_v17  ;;  %v1234_v6 = vadd.f32 %v1036_v0, %v4639_v16  ;;  %5716 = vst [vmem:[#allocation56_spill] sm:$0xff] %v4668_v5 }
 0x353   :  { %v2110_v7 = vrot.slane %v2100_v42, %v2109_v2  ;;  %v2117_v4 = vrot.slane %v2101_v22, %v2109_v2  ;;  %v2124_v3 = vrot.slane %v2102_v26, %v2109_v2  ;;  %v2131_v10 = vrot.slane %v2103_v43, %v2109_v2  ;;  %v4678_v42 = vld [vmem:[#allocation3 + $0x224] ss:$16 sps:$4 sm:$0xff]   ;;  %v4680_v22 = vld [vmem:[#allocation3 + $0x22c] ss:$16 sps:$4 sm:$0xff]  }
 0x354   :  { %v1236_v9 = vmax.f32 %v1232_v44, 0.0  ;;  %v1238_v8 = vmax.f32 %v1234_v6, 0.0  ;;  %v1239_v14 = vpack.c.bf16 %v1235_v18, %v1235_v18  ;;  %5717 = vst [vmem:[#allocation57_spill] sm:$0xff] %v4678_v42  ;;  %5718 = vst [vmem:[#allocation58_spill] sm:$0xff] %v4680_v22  ;;  %v4692_v44 = vld [vmem:[#allocation3 + $0x228] ss:$16 sps:$4 sm:$0xff]  }
 0x355   :  { %v2132_v11 = vcombine.low %v2110_v7, %v2124_v3  ;;  %v2133_v12 = vcombine.high %v2110_v7, %v2124_v3  ;;  %v2134_v25 = vcombine.low %v2117_v4, %v2131_v10  ;;  %v2135_v35 = vcombine.high %v2117_v4, %v2131_v10  ;;  %5720 = vst [vmem:[#allocation60_spill] sm:$0xff] %v4692_v44  ;;  %v4704_v3 = vld [vmem:[#allocation3 + $0x244] ss:$16 sps:$4 sm:$0xff]   ;;  %v4706_v10 = vld [vmem:[#allocation3 + $0x24c] ss:$16 sps:$4 sm:$0xff]  }
 0x356   :  { %v1240_v36 = vpack.c.bf16 %v1236_v9, %v1236_v9  ;;  %v1242_v52 = vpack.c.bf16 %v1238_v8, %v1238_v8  ;;  %5721 = vst [vmem:[#allocation61_spill] sm:$0xff] %v4704_v3  ;;  %5722 = vst [vmem:[#allocation62_spill] sm:$0xff] %v4706_v10 }
 0x357   :  { %v4670_v33 = vrot.slane %v2132_v11, %v2109_v2  ;;  %v4672_v1 = vrot.slane %v2134_v25, %v2109_v2  ;;  %v4674_v0 = vrot.slane %v2133_v12, %v2109_v2  ;;  %v4676_v13 = vrot.slane %v2135_v35, %v2109_v2  ;;  %v4690_v2 = vld [vmem:[#allocation3 + $0x220] ss:$16 sps:$4 sm:$0xff]  }
 0x358   :  { %1936 = vmatprep.mubr.bf16.mxu0 %v1240_v36  ;;  %2018 = vmatprep.mubr.bf16.mxu1 %v1240_v36  ;;  %5719 = vst [vmem:[#allocation59_spill] sm:$0xff] %v4690_v2 }
 0x359   :  { %1937 = vmatmul.mubr.bf16.vlgmr.msra.gmra.mrb[16].mxu0 %v1239_v14  ;;  %2019 = vmatmul.mubr.bf16.vlgmr.msra.gmra.mrb[16].mxu1 %v1239_v14  ;;  %v2175_v26 = vrot.slane %v4670_v33, %v4645_v19  ;;  %v2191_v43 = vrot.slane %v4674_v0, %v4645_v19  ;;  %v2171_v18 = vrot.slane %v4670_v33, %v4641_v15 }
 0x35a   :  { %1946 = vmatpush1.bf16.msra.mxu0 %v4666_v20  ;;  %2028 = vmatpush1.bf16.msra.mxu1 %v4668_v5  ;;  %v2187_v6 = vrot.slane %v4674_v0, %v4641_v15  ;;  %v4698_v7 = vcombine.high %v4670_v33, %v4670_v33  ;;  %v4702_v4 = vcombine.high %v4674_v0, %v4674_v0 }
 0x35b   :  { %1977 = vmatprep.mubr.bf16.mxu0 %v1242_v52  ;;  %2059 = vmatprep.mubr.bf16.mxu1 %v1242_v52  ;;  %v2329_v9 = vadd.f32 %v2175_v26, %v4636_v17  ;;  %v2333_v8 = vadd.f32 %v2191_v43, %v4636_v17  ;;  %v2328_v11 = vadd.f32 %v2171_v18, %v4630_v27  ;;  %v4722_v43 = vld [vmem:[#allocation3 + $0x240] ss:$16 sps:$4 sm:$0xff]   ;;  %v4724_v18 = vld [vmem:[#allocation3 + $0x248] ss:$16 sps:$4 sm:$0xff]  }
 0x35c   :  { %1947 = vmatprep.subr.bf16.mxu0 %v4678_v42  ;;  %2029 = vmatprep.subr.bf16.mxu1 %v4680_v22  ;;  %v2332_v12 = vadd.f32 %v2187_v6, %v4630_v27  ;;  %v2207_v25 = vrot.slane %v4698_v7, %v4645_v19  ;;  %v2223_v35 = vrot.slane %v4702_v4, %v4645_v19 }
 0x35d   :  { %v2361_v36 = vmax.f32 %v2329_v9, 0.0  ;;  %v2365_v14 = vmax.f32 %v2333_v8, 0.0  ;;  %v2360_v52 = vmax.f32 %v2328_v11, 0.0  ;;  %v2203_v26 = vrot.slane %v4698_v7, %v4641_v15  ;;  %5723 = vst [vmem:[#allocation63_spill] sm:$0xff] %v4722_v43  ;;  %5724 = vst [vmem:[#allocation64_spill] sm:$0xff] %v4724_v18 }
 0x35e   :  { %1948 = vmatpush1.bf16.msra.mxu0 %v4690_v2  ;;  %2030 = vmatpush1.bf16.msra.mxu1 %v4692_v44  ;;  %v2364_v6 = vmax.f32 %v2332_v12, 0.0  ;;  %v2337_v22 = vadd.f32 %v2207_v25, %v4636_v17  ;;  %v2341_v42 = vadd.f32 %v2223_v35, %v4636_v17  ;;  %v2219_v9 = vrot.slane %v4702_v4, %v4641_v15  ;;  %v4732_v8 = vld [vmem:[#allocation3 + $0x264] ss:$16 sps:$4 sm:$0xff]   ;;  %v4734_v11 = vld [vmem:[#allocation3 + $0x26c] ss:$16 sps:$4 sm:$0xff]  }
 0x35f   :  { %1949 = vmatprep.subr.bf16.mxu0 %v4704_v3  ;;  %2031 = vmatprep.subr.bf16.mxu1 %v4706_v10  ;;  %5725 = vst [vmem:[#allocation65_spill] sm:$0xff] %v4732_v8  ;;  %5726 = vst [vmem:[#allocation66_spill] sm:$0xff] %v4734_v11  ;;  %v4736_v44 = vpack.c.bf16 %v2365_v14, %v2361_v36  ;;  %v2336_v2 = vadd.f32 %v2203_v26, %v4630_v27  ;;  %v4751_v14 = vld [vmem:[#allocation3 + $0x260] ss:$16 sps:$4 sm:$0xff]  }
 0x360   :  { %v2239_v12 = vrot.slane %v4672_v1, %v4645_v19  ;;  %v4741_v25 = vpack.c.bf16 %v2364_v6, %v2360_v52  ;;  %v2369_v35 = vmax.f32 %v2337_v22, 0.0  ;;  %v2373_v5 = vmax.f32 %v2341_v42, 0.0  ;;  %5728 = vst [vmem:[#allocation68_spill] sm:$0xff] %v4751_v14  ;;  %v4753_v52 = vld [vmem:[#allocation3 + $0x268] ss:$16 sps:$4 sm:$0xff]  }
 0x361   :  { %v2340_v20 = vadd.f32 %v2219_v9, %v4630_v27  ;;  %v2368_v3 = vmax.f32 %v2336_v2, 0.0  ;;  %v2255_v10 = vrot.slane %v4676_v13, %v4645_v19  ;;  %v2235_v36 = vrot.slane %v4672_v1, %v4641_v15  ;;  %5729 = vst [vmem:[#allocation69_spill] sm:$0xff] %v4753_v52  ;;  %v4765_v6 = vld [vmem:[#allocation3 + $0x284] ss:$16 sps:$4 sm:$0xff]   ;;  %v4767_v9 = vld [vmem:[#allocation3 + $0x28c] ss:$16 sps:$4 sm:$0xff]  }
 0x362   :  { %5727 = vst [vmem:[#allocation67_spill] sm:$0xff] %v4741_v25  ;;  %v2345_v63 = vadd.f32 %v2239_v12, %v4636_v17  ;;  %1950 = vmatpush1.bf16.msra.mxu0 %v4722_v43  ;;  %2032 = vmatpush1.bf16.msra.mxu1 %v4724_v18  ;;  %v4755_v42 = vpack.c.bf16 %v2373_v5, %v2369_v35  ;;  %5731 = vst [vmem:[#allocation71_spill] sm:$0xff] %v4765_v6 }
 0x363   :  { %v2372_v22 = vmax.f32 %v2340_v20, 0.0  ;;  %v2251_v2 = vrot.slane %v4676_v13, %v4641_v15  ;;  %v4761_v26 = vcombine.high %v4672_v1, %v4672_v1  ;;  %1951 = vmatprep.subr.bf16.mxu0 %v4732_v8  ;;  %2033 = vmatprep.subr.bf16.mxu1 %v4734_v11  ;;  %5732 = vst [vmem:[#allocation72_spill] sm:$0xff] %v4767_v9 }
 0x364   :  { %5730 = vst [vmem:[#allocation70_spill] sm:$0xff] %v4755_v42  ;;  %v2349_v12 = vadd.f32 %v2255_v10, %v4636_v17  ;;  %v2377_v5 = vmax.f32 %v2345_v63, 0.0  ;;  %v2344_v20 = vadd.f32 %v2235_v36, %v4630_v27  ;;  %v4773_v35 = vcombine.high %v4676_v13, %v4676_v13  ;;  %v4790_v36 = vld [vmem:[#allocation3 + $0x288] ss:$16 sps:$4 sm:$0xff]  }
 0x365   :  { %v4775_v18 = vpack.c.bf16 %v2372_v22, %v2368_v3  ;;  %v2348_v43 = vadd.f32 %v2251_v2, %v4630_v27  ;;  %v2271_v11 = vrot.slane %v4761_v26, %v4645_v19  ;;  %v2267_v8 = vrot.slane %v4761_v26, %v4641_v15  ;;  %v4788_v3 = vld [vmem:[#allocation3 + $0x280] ss:$16 sps:$4 sm:$0xff]  }
 0x366   :  { %v2381_v42 = vmax.f32 %v2349_v12, 0.0  ;;  %v2376_v25 = vmax.f32 %v2344_v20, 0.0  ;;  %v2287_v63 = vrot.slane %v4773_v35, %v4645_v19  ;;  %v2283_v10 = vrot.slane %v4773_v35, %v4641_v15  ;;  %1952 = vmatpush1.bf16.msra.mxu0 %v4751_v14  ;;  %2034 = vmatpush1.bf16.msra.mxu1 %v4753_v52  ;;  %v4798_v19 = vld [vmem:[#allocation3 + $0x2a4] ss:$16 sps:$4 sm:$0xff]   ;;  %v4800_v15 = vld [vmem:[#allocation3 + $0x2ac] ss:$16 sps:$4 sm:$0xff]  }
 0x367   :  { %5733 = vst [vmem:[#allocation73_spill] sm:$0xff] %v4775_v18  ;;  %v2380_v22 = vmax.f32 %v2348_v43, 0.0  ;;  %v2353_v2 = vadd.f32 %v2271_v11, %v4636_v17  ;;  %v2352_v12 = vadd.f32 %v2267_v8, %v4630_v27  ;;  %v2183_v20 = vrot.slane %v4670_v33, %v4647_v34  ;;  %1953 = vmatprep.subr.bf16.mxu0 %v4765_v6 }
 0x368   :  { %2035 = vmatprep.subr.bf16.mxu1 %v4767_v9  ;;  %5734 = vst [vmem:[#allocation74_spill] sm:$0xff] %v4800_v15  ;;  %v4802_v52 = vpack.c.bf16 %v2381_v42, %v2377_v5  ;;  %v2357_v14 = vadd.f32 %v2287_v63, %v4636_v17  ;;  %v2356_v43 = vadd.f32 %v2283_v10, %v4630_v27  ;;  %v4815_v17 = vld [vmem:[#allocation3 + $0x2a0] ss:$16 sps:$4 sm:$0xff]   ;;  %v4817_v27 = vld [vmem:[#allocation3 + $0x2a8] ss:$16 sps:$4 sm:$0xff]  }
 0x369   :  { %v4806_v11 = vpack.c.bf16 %v2380_v22, %v2376_v25  ;;  %v2385_v8 = vmax.f32 %v2353_v2, 0.0  ;;  %v2384_v18 = vmax.f32 %v2352_v12, 0.0  ;;  %v2199_v62 = vrot.slane %v4674_v0, %v4647_v34  ;;  %v4828_v5 = vld [vmem:[#allocation3 + $0x2cc] ss:$16 sps:$4 sm:$0xff]  }
 0x36a   :  { %v2389_v6 = vmax.f32 %v2357_v14, 0.0  ;;  %v2388_v61 = vmax.f32 %v2356_v43, 0.0  ;;  %v2331_v9 = vadd.f32 %v2183_v20, %v4639_v16  ;;  %v2179_v60 = vrot.slane %v4670_v33, %v4643_v21  ;;  %1954 = vmatpush1.bf16.msra.mxu0 %v4788_v3  ;;  %2036 = vmatpush1.bf16.msra.mxu1 %v4790_v36  ;;  %v4826_v33 = vld [vmem:[#allocation3 + $0x2c4] ss:$16 sps:$4 sm:$0xff]   ;;  %5735 = vst [vmem:[#allocation75_spill] sm:$0xff] %v4828_v5 }
 0x36b   :  { %v2335_v25 = vadd.f32 %v2199_v62, %v4639_v16  ;;  %v2195_v42 = vrot.slane %v4674_v0, %v4643_v21  ;;  %v2215_v14 = vrot.slane %v4698_v7, %v4647_v34  ;;  %1955 = vmatprep.subr.bf16.mxu0 %v4798_v19  ;;  %2037 = vmatprep.subr.bf16.mxu1 %v4800_v15 }
 0x36c   :  { %v4830_v63 = vpack.c.bf16 %v2389_v6, %v2385_v8  ;;  %v4832_v10 = vpack.c.bf16 %v2388_v61, %v2384_v18  ;;  %v2363_v22 = vmax.f32 %v2331_v9, 0.0  ;;  %v2330_v62 = vadd.f32 %v2179_v60, %v4633_v30  ;;  %v4847_v60 = vld [vmem:[#allocation3 + $0x2c0] ss:$16 sps:$4 sm:$0xff]   ;;  %v4849_v18 = vld [vmem:[#allocation3 + $0x2c8] ss:$16 sps:$4 sm:$0xff]  }
 0x36d   :  { %v2367_v2 = vmax.f32 %v2335_v25, 0.0  ;;  %v2334_v0 = vadd.f32 %v2195_v42, %v4633_v30  ;;  %v2231_v12 = vrot.slane %v4702_v4, %v4647_v34  ;;  %v2339_v20 = vadd.f32 %v2215_v14, %v4639_v16  ;;  %v4858_v42 = vld [vmem:[#allocation3 + $0x2ec] ss:$16 sps:$4 sm:$0xff]  }
 0x36e   :  { %5736 = vst [vmem:[#allocation76_spill] sm:$0xff] %v4832_v10  ;;  %v2362_v43 = vmax.f32 %v2330_v62, 0.0  ;;  %v2211_v15 = vrot.slane %v4698_v7, %v4643_v21  ;;  %v2227_v6 = vrot.slane %v4702_v4, %v4643_v21  ;;  %v2247_v61 = vrot.slane %v4672_v1, %v4647_v34  ;;  %1956 = vmatpush1.bf16.msra.mxu0 %v4815_v17  ;;  %v4856_v4 = vld [vmem:[#allocation3 + $0x2e4] ss:$16 sps:$4 sm:$0xff]  }
 0x36f   :  { %2038 = vmatpush1.bf16.msra.mxu1 %v4817_v27  ;;  %v4851_v9 = vpack.c.bf16 %v2367_v2, %v2363_v22  ;;  %v2366_v8 = vmax.f32 %v2334_v0, 0.0  ;;  %v2343_v25 = vadd.f32 %v2231_v12, %v4639_v16  ;;  %v2371_v7 = vmax.f32 %v2339_v20, 0.0  ;;  %1957 = vmatprep.subr.bf16.mxu0 %v4826_v33  ;;  %5738 = vst [vmem:[#allocation78_spill] sm:$0xff] %v4856_v4 }
 0x370   :  { %2039 = vmatprep.subr.bf16.mxu1 %v4828_v5  ;;  %5739 = vst [vmem:[#allocation79_spill] sm:$0xff] %v4858_v42  ;;  %v2338_v14 = vadd.f32 %v2211_v15, %v4633_v30  ;;  %v2342_v62 = vadd.f32 %v2227_v6, %v4633_v30  ;;  %v2263_v22 = vrot.slane %v4676_v13, %v4647_v34  ;;  %v4874_v6 = vld [vmem:[#allocation3 + $0x2e0] ss:$16 sps:$4 sm:$0xff]  }
 0x371   :  { %5737 = vst [vmem:[#allocation77_spill] sm:$0xff] %v4851_v9  ;;  %v4864_v2 = vpack.c.bf16 %v2366_v8, %v2362_v43  ;;  %v2375_v0 = vmax.f32 %v2343_v25, 0.0  ;;  %v2347_v12 = vadd.f32 %v2247_v61, %v4639_v16  ;;  %v2243_v20 = vrot.slane %v4672_v1, %v4643_v21  ;;  %v4876_v43 = vld [vmem:[#allocation3 + $0x2e8] ss:$16 sps:$4 sm:$0xff]  }
 0x372   :  { %v2370_v9 = vmax.f32 %v2338_v14, 0.0  ;;  %v2374_v5 = vmax.f32 %v2342_v62, 0.0  ;;  %v2351_v10 = vadd.f32 %v2263_v22, %v4639_v16  ;;  %v2259_v15 = vrot.slane %v4676_v13, %v4643_v21  ;;  %1958 = vmatpush1.bf16.msra.mxu0 %v4847_v60  ;;  %v4885_v13 = vld [vmem:[#allocation3 + $0x304] ss:$16 sps:$4 sm:$0xff]   ;;  %v4887_v14 = vld [vmem:[#allocation3 + $0x30c] ss:$16 sps:$4 sm:$0xff]  }
 0x373   :  { %5740 = vst [vmem:[#allocation80_spill] sm:$0xff] %v4864_v2  ;;  %2040 = vmatpush1.bf16.msra.mxu1 %v4849_v18  ;;  %v4878_v8 = vpack.c.bf16 %v2375_v0, %v2371_v7  ;;  %v2379_v61 = vmax.f32 %v2347_v12, 0.0  ;;  %v2346_v1 = vadd.f32 %v2243_v20, %v4633_v30  ;;  %v2279_v25 = vrot.slane %v4761_v26, %v4647_v34 }
 0x374   :  { %1959 = vmatprep.subr.bf16.mxu0 %v4856_v4  ;;  %2041 = vmatprep.subr.bf16.mxu1 %v4858_v42  ;;  %v4889_v62 = vpack.c.bf16 %v2374_v5, %v2370_v9  ;;  %v2383_v22 = vmax.f32 %v2351_v10, 0.0  ;;  %v2350_v7 = vadd.f32 %v2259_v15, %v4633_v30  ;;  %v2295_v0 = vrot.slane %v4773_v35, %v4647_v34  ;;  %v4904_v10 = vld [vmem:[#allocation3 + $0x300] ss:$16 sps:$4 sm:$0xff]   ;;  %v4906_v9 = vld [vmem:[#allocation3 + $0x308] ss:$16 sps:$4 sm:$0xff]  }
 0x375   :  { %5741 = vst [vmem:[#allocation81_spill] sm:$0xff] %v4878_v8  ;;  %v2378_v12 = vmax.f32 %v2346_v1, 0.0  ;;  %v2355_v20 = vadd.f32 %v2279_v25, %v4639_v16  ;;  %v2275_v8 = vrot.slane %v4761_v26, %v4643_v21  ;;  %v2291_v2 = vrot.slane %v4773_v35, %v4643_v21  ;;  %v4912_v35 = vld [vmem:[#allocation3 + $0x324] ss:$16 sps:$4 sm:$0xff]   ;;  %v4960_v34 = vld [vmem:[#allocation3 + $0x380] ss:$16 sps:$4 sm:$0xff]  }
 0x376   :  { %5742 = vst [vmem:[#allocation82_spill] sm:$0xff] %v4889_v62  ;;  %v4899_v42 = vpack.c.bf16 %v2383_v22, %v2379_v61  ;;  %v2382_v4 = vmax.f32 %v2350_v7, 0.0  ;;  %v2359_v5 = vadd.f32 %v2295_v0, %v4639_v16  ;;  %1960 = vmatpush1.bf16.msra.mxu0 %v4874_v6  ;;  %v4914_v16 = vld [vmem:[#allocation3 + $0x32c] ss:$16 sps:$4 sm:$0xff]   ;;  %5749 = vst [vmem:[#allocation89_spill] sm:$0xff] %v4960_v34 }
 0x377   :  { %2042 = vmatpush1.bf16.msra.mxu1 %v4876_v43  ;;  %v2387_v15 = vmax.f32 %v2355_v20, 0.0  ;;  %v2354_v1 = vadd.f32 %v2275_v8, %v4633_v30  ;;  %v2358_v26 = vadd.f32 %v2291_v2, %v4633_v30  ;;  %1961 = vmatprep.subr.bf16.mxu0 %v4885_v13  ;;  %v4922_v30 = vld [vmem:[#allocation3 + $0x320] ss:$16 sps:$4 sm:$0xff]   ;;  %v4924_v2 = vld [vmem:[#allocation3 + $0x328] ss:$16 sps:$4 sm:$0xff]  }
 0x378   :  { %5743 = vst [vmem:[#allocation83_spill] sm:$0xff] %v4899_v42  ;;  %2043 = vmatprep.subr.bf16.mxu1 %v4887_v14  ;;  %v4916_v61 = vpack.c.bf16 %v2382_v4, %v2378_v12  ;;  %v2391_v25 = vmax.f32 %v2359_v5, 0.0  ;;  %v4930_v4 = vld [vmem:[#allocation3 + $0x344] ss:$16 sps:$4 sm:$0xff]   ;;  %v4932_v12 = vld [vmem:[#allocation3 + $0x34c] ss:$16 sps:$4 sm:$0xff]  }
 0x379   :  { %v2386_v22 = vmax.f32 %v2354_v1, 0.0  ;;  %v2390_v7 = vmax.f32 %v2358_v26, 0.0  ;;  %v4936_v20 = vld [vmem:[#allocation3 + $0x340] ss:$16 sps:$4 sm:$0xff]   ;;  %v4938_v5 = vld [vmem:[#allocation3 + $0x348] ss:$16 sps:$4 sm:$0xff]  }
 0x37a   :  { %5744 = vst [vmem:[#allocation84_spill] sm:$0xff] %v4916_v61  ;;  %v4918_v0 = vpack.c.bf16 %v2391_v25, %v2387_v15  ;;  %1962 = vmatpush1.bf16.msra.mxu0 %v4904_v10  ;;  %v4942_v15 = vld [vmem:[#allocation3 + $0x364] ss:$16 sps:$4 sm:$0xff]   ;;  %v4944_v1 = vld [vmem:[#allocation3 + $0x36c] ss:$16 sps:$4 sm:$0xff]  }
 0x37b   :  { %2044 = vmatpush1.bf16.msra.mxu1 %v4906_v9  ;;  %v4926_v8 = vpack.c.bf16 %v2390_v7, %v2386_v22  ;;  %1963 = vmatprep.subr.bf16.mxu0 %v4912_v35  ;;  %v4948_v26 = vld [vmem:[#allocation3 + $0x360] ss:$16 sps:$4 sm:$0xff]   ;;  %v4950_v25 = vld [vmem:[#allocation3 + $0x368] ss:$16 sps:$4 sm:$0xff]   ;;  %v4954_v22 = vld [vmem:[#allocation3 + $0x384] ss:$16 sps:$4 sm:$0xff]  }
 0x37c   :  { %5745 = vst [vmem:[#allocation85_spill] sm:$0xff] %v4918_v0  ;;  %2045 = vmatprep.subr.bf16.mxu1 %v4914_v16  ;;  %5747 = vst [vmem:[#allocation87_spill] sm:$0xff] %v4954_v22  ;;  %v4956_v7 = vld [vmem:[#allocation3 + $0x38c] ss:$16 sps:$4 sm:$0xff]   ;;  %v4962_v21 = vld [vmem:[#allocation3 + $0x388] ss:$16 sps:$4 sm:$0xff]  }
 0x37d   :  { %5746 = vst [vmem:[#allocation86_spill] sm:$0xff] %v4926_v8  ;;  %5748 = vst [vmem:[#allocation88_spill] sm:$0xff] %v4956_v7  ;;  %v4966_v8 = vld [vmem:[#allocation3 + $0x3a4] ss:$16 sps:$4 sm:$0xff]   ;;  %v4968_v0 = vld [vmem:[#allocation3 + $0x3ac] ss:$16 sps:$4 sm:$0xff]  }
 0x37e   :  { %1964 = vmatpush1.bf16.msra.mxu0 %v4922_v30  ;;  %5750 = vst [vmem:[#allocation90_spill] sm:$0xff] %v4962_v21  ;;  %5751 = vst [vmem:[#allocation91_spill] sm:$0xff] %v4966_v8  ;;  %v4972_v61 = vld [vmem:[#allocation3 + $0x3a0] ss:$16 sps:$4 sm:$0xff]   ;;  %v4974_v42 = vld [vmem:[#allocation3 + $0x3a8] ss:$16 sps:$4 sm:$0xff]  }
 0x37f   :  { %2046 = vmatpush1.bf16.msra.mxu1 %v4924_v2  ;;  %1965 = vmatprep.subr.bf16.mxu0 %v4930_v4  ;;  %5752 = vst [vmem:[#allocation92_spill] sm:$0xff] %v4968_v0  ;;  %5753 = vst [vmem:[#allocation93_spill] sm:$0xff] %v4972_v61  ;;  %v4978_v62 = vld [vmem:[#allocation3 + $0x3c4] ss:$16 sps:$4 sm:$0xff]  }
 0x380   :  { %2047 = vmatprep.subr.bf16.mxu1 %v4932_v12  ;;  %5754 = vst [vmem:[#allocation94_spill] sm:$0xff] %v4974_v42 }
 0x382   :  { %1966 = vmatpush1.bf16.msra.mxu0 %v4936_v20 }
 0x383   :  { %2048 = vmatpush1.bf16.msra.mxu1 %v4938_v5  ;;  %1967 = vmatprep.subr.bf16.mxu0 %v4942_v15 }
 0x384   :  { %2049 = vmatprep.subr.bf16.mxu1 %v4944_v1 }
 0x386   :  { %1968 = vmatpush1.bf16.msra.mxu0 %v4948_v26 }
 0x387   :  { %2050 = vmatpush1.bf16.msra.mxu1 %v4950_v25  ;;  %1969 = vmatprep.subr.bf16.mxu0 %v4954_v22  ;;  %v4980_v22 = vld [vmem:[#allocation3 + $0x3cc] ss:$16 sps:$4 sm:$0xff]  }
 0x388   :  { %2051 = vmatprep.subr.bf16.mxu1 %v4956_v7  ;;  %5755 = vst [vmem:[#allocation95_spill] sm:$0xff] %v4980_v22  ;;  %v4984_v7 = vld [vmem:[#allocation3 + $0x3c0] ss:$16 sps:$4 sm:$0xff]  }
 0x38a   :  { %1970 = vmatpush1.bf16.msra.mxu0 %v4960_v34  ;;  %v4986_v34 = vld [vmem:[#allocation3 + $0x3c8] ss:$16 sps:$4 sm:$0xff]  }
 0x38b   :  { %2052 = vmatpush1.bf16.msra.mxu1 %v4962_v21  ;;  %1971 = vmatprep.subr.bf16.mxu0 %v4966_v8  ;;  %v4990_v21 = vld [vmem:[#allocation3 + $0x3e4] ss:$16 sps:$4 sm:$0xff]   ;;  %v4992_v8 = vld [vmem:[#allocation3 + $0x3ec] ss:$16 sps:$4 sm:$0xff]  }
 0x38c   :  { %2053 = vmatprep.subr.bf16.mxu1 %v4968_v0  ;;  %v4996_v0 = vld [vmem:[#allocation3 + $0x3e0] ss:$16 sps:$4 sm:$0xff]  }
 0x38e   :  { %1972 = vmatpush1.bf16.msra.mxu0 %v4972_v61  ;;  %v4998_v61 = vld [vmem:[#allocation3 + $0x3e8] ss:$16 sps:$4 sm:$0xff]  }
 0x38f   :  { %2054 = vmatpush1.bf16.msra.mxu1 %v4974_v42  ;;  %1973 = vmatprep.subr.bf16.mxu0 %v4978_v62  ;;  %v1237_v42 = vmax.f32 %v4662_v41, 0.0  ;;  %v5780_v41 = vld [vmem:[#allocation34_spill] sm:$0xff] }
 0x390   :  { %2055 = vmatprep.subr.bf16.mxu1 %v4980_v22 }
 0x391   :  { %v1241_v22 = vpack.c.bf16 %v1237_v42, %v1237_v42  ;;  %v5782_v42 = vld [vmem:[#allocation33_spill] sm:$0xff] }
 0x392   :  { %1974 = vmatpush1.bf16.msra.mxu0 %v4984_v7 }
 0x393   :  { %2056 = vmatpush1.bf16.msra.mxu1 %v4986_v34  ;;  %1975 = vmatprep.subr.bf16.mxu0 %v4990_v21 }
 0x394   :  { %2057 = vmatprep.subr.bf16.mxu1 %v4992_v8 }
 0x396   :  { %1976 = vmatpush1.bf16.msra.mxu0 %v4996_v0 }
 0x397   :  { %2058 = vmatpush1.bf16.msra.mxu1 %v4998_v61  ;;  %2520 = vmatprep.subr.bf16.mxu0 %v4410_v23  ;;  %v5756_v23 = vld [vmem:[#allocation9_spill] sm:$0xff] }
 0x398   :  { %2666 = vmatprep.subr.bf16.mxu1 %v4412_v24  ;;  %v5757_v24 = vld [vmem:[#allocation10_spill] sm:$0xff] }
 0x399   :  { %1978 = vmatmul.mubr.bf16.vlgmr.msra.gmra.mrb[16].mxu0 %v1241_v22 }
 0x39a   :  { %2060 = vmatmul.mubr.bf16.vlgmr.msra.gmra.mrb[16].mxu1 %v1241_v22  ;;  %2521 = vmatpush1.bf16.msra.mxu0 %v4416_v28  ;;  %v5758_v28 = vld [vmem:[#allocation11_spill] sm:$0xff] }
 0x39b   :  { %2552 = vmatprep.mubr.bf16.mxu0 %v4736_v44  ;;  %2667 = vmatpush1.bf16.msra.mxu1 %v4418_v29  ;;  %v5759_v29 = vld [vmem:[#allocation12_spill] sm:$0xff]  ;;  %v5783_v22 = vld [vmem:[#allocation35_spill] sm:$0xff] }
 0x39c   :  { %2698 = vmatprep.mubr.bf16.mxu1 %v4736_v44  ;;  %2522 = vmatprep.subr.bf16.mxu0 %v4422_v31  ;;  %v5760_v31 = vld [vmem:[#allocation13_spill] sm:$0xff]  ;;  %v5781_v44 = vld [vmem:[#allocation36_spill] sm:$0xff] }
 0x39d   :  { %2668 = vmatprep.subr.bf16.mxu1 %v4424_v32  ;;  %v5761_v32 = vld [vmem:[#allocation14_spill] sm:$0xff] }
 0x39e   :  { %2523 = vmatpush1.bf16.msra.mxu0 %v4438_v37  ;;  %v5762_v37 = vld [vmem:[#allocation15_spill] sm:$0xff] }
 0x39f   :  { %2669 = vmatpush1.bf16.msra.mxu1 %v4440_v38  ;;  %2524 = vmatprep.subr.bf16.mxu0 %v4444_v39  ;;  %v5763_v38 = vld [vmem:[#allocation16_spill] sm:$0xff]  ;;  %v5764_v39 = vld [vmem:[#allocation17_spill] sm:$0xff] }
 0x3a0   :  { %2670 = vmatprep.subr.bf16.mxu1 %v4446_v40  ;;  %v5765_v40 = vld [vmem:[#allocation18_spill] sm:$0xff] }
 0x3a2   :  { %2525 = vmatpush1.bf16.msra.mxu0 %v4458_v45  ;;  %v5766_v45 = vld [vmem:[#allocation19_spill] sm:$0xff] }
 0x3a3   :  { %2671 = vmatpush1.bf16.msra.mxu1 %v4460_v46  ;;  %2526 = vmatprep.subr.bf16.mxu0 %v4464_v47  ;;  %v5767_v46 = vld [vmem:[#allocation20_spill] sm:$0xff]  ;;  %v5768_v47 = vld [vmem:[#allocation21_spill] sm:$0xff] }
 0x3a4   :  { %2672 = vmatprep.subr.bf16.mxu1 %v4466_v48  ;;  %v5769_v48 = vld [vmem:[#allocation22_spill] sm:$0xff] }
 0x3a6   :  { %2527 = vmatpush1.bf16.msra.mxu0 %v4470_v49  ;;  %v5770_v49 = vld [vmem:[#allocation23_spill] sm:$0xff] }
 0x3a7   :  { %2673 = vmatpush1.bf16.msra.mxu1 %v4472_v50  ;;  %2528 = vmatprep.subr.bf16.mxu0 %v4476_v51  ;;  %v5771_v50 = vld [vmem:[#allocation24_spill] sm:$0xff]  ;;  %v5772_v51 = vld [vmem:[#allocation25_spill] sm:$0xff] }
 0x3a8   :  { %2674 = vmatprep.subr.bf16.mxu1 %v4478_v53  ;;  %v5773_v53 = vld [vmem:[#allocation26_spill] sm:$0xff] }
 0x3aa   :  { %2529 = vmatpush1.bf16.msra.mxu0 %v4482_v54  ;;  %v5774_v54 = vld [vmem:[#allocation27_spill] sm:$0xff] }
 0x3ab   :  { %2675 = vmatpush1.bf16.msra.mxu1 %v4484_v55  ;;  %2530 = vmatprep.subr.bf16.mxu0 %v4488_v56  ;;  %v5775_v55 = vld [vmem:[#allocation28_spill] sm:$0xff]  ;;  %v5776_v56 = vld [vmem:[#allocation29_spill] sm:$0xff] }
 0x3ac   :  { %2676 = vmatprep.subr.bf16.mxu1 %v4490_v57  ;;  %v5777_v57 = vld [vmem:[#allocation30_spill] sm:$0xff] }
 0x3ae   :  { %2531 = vmatpush1.bf16.msra.mxu0 %v4494_v58  ;;  %v5778_v58 = vld [vmem:[#allocation31_spill] sm:$0xff] }
 0x3af   :  { %2677 = vmatpush1.bf16.msra.mxu1 %v4496_v59  ;;  %2532 = vmatprep.subr.bf16.mxu0 %v5756_v23  ;;  %v5779_v59 = vld [vmem:[#allocation32_spill] sm:$0xff]  ;;  %v5784_v23 = vld [vmem:[#allocation37_spill] sm:$0xff] }
 0x3b0   :  { %2678 = vmatprep.subr.bf16.mxu1 %v5757_v24  ;;  %v5785_v24 = vld [vmem:[#allocation38_spill] sm:$0xff] }
 0x3b2   :  { %2533 = vmatpush1.bf16.msra.mxu0 %v5758_v28  ;;  %v5786_v28 = vld [vmem:[#allocation39_spill] sm:$0xff] }
 0x3b3   :  { %2679 = vmatpush1.bf16.msra.mxu1 %v5759_v29  ;;  %2534 = vmatprep.subr.bf16.mxu0 %v5760_v31  ;;  %v5787_v29 = vld [vmem:[#allocation40_spill] sm:$0xff]  ;;  %v5788_v31 = vld [vmem:[#allocation41_spill] sm:$0xff] }
 0x3b4   :  { %2680 = vmatprep.subr.bf16.mxu1 %v5761_v32  ;;  %v5789_v32 = vld [vmem:[#allocation42_spill] sm:$0xff] }
 0x3b6   :  { %2535 = vmatpush1.bf16.msra.mxu0 %v5762_v37  ;;  %v5790_v37 = vld [vmem:[#allocation43_spill] sm:$0xff] }
 0x3b7   :  { %2681 = vmatpush1.bf16.msra.mxu1 %v5763_v38  ;;  %2536 = vmatprep.subr.bf16.mxu0 %v5764_v39  ;;  %v5791_v38 = vld [vmem:[#allocation44_spill] sm:$0xff]  ;;  %v5792_v39 = vld [vmem:[#allocation45_spill] sm:$0xff] }
 0x3b8   :  { %2682 = vmatprep.subr.bf16.mxu1 %v5765_v40  ;;  %v5793_v40 = vld [vmem:[#allocation46_spill] sm:$0xff] }
 0x3ba   :  { %2537 = vmatpush1.bf16.msra.mxu0 %v5766_v45  ;;  %v5794_v45 = vld [vmem:[#allocation47_spill] sm:$0xff] }
 0x3bb   :  { %2683 = vmatpush1.bf16.msra.mxu1 %v5767_v46  ;;  %2538 = vmatprep.subr.bf16.mxu0 %v5768_v47  ;;  %v5795_v46 = vld [vmem:[#allocation48_spill] sm:$0xff]  ;;  %v5796_v47 = vld [vmem:[#allocation49_spill] sm:$0xff] }
 0x3bc   :  { %2684 = vmatprep.subr.bf16.mxu1 %v5769_v48  ;;  %v5797_v48 = vld [vmem:[#allocation50_spill] sm:$0xff] }
 0x3be   :  { %2539 = vmatpush1.bf16.msra.mxu0 %v5770_v49  ;;  %v5798_v49 = vld [vmem:[#allocation67_spill] sm:$0xff] }
 0x3bf   :  { %2685 = vmatpush1.bf16.msra.mxu1 %v5771_v50  ;;  %2540 = vmatprep.subr.bf16.mxu0 %v5772_v51  ;;  %v5799_v50 = vld [vmem:[#allocation70_spill] sm:$0xff]  ;;  %v5800_v51 = vld [vmem:[#allocation55_spill] sm:$0xff] }
 0x3c0   :  { %2686 = vmatprep.subr.bf16.mxu1 %v5773_v53  ;;  %v5801_v53 = vld [vmem:[#allocation56_spill] sm:$0xff] }
 0x3c2   :  { %2541 = vmatpush1.bf16.msra.mxu0 %v5774_v54  ;;  %v5802_v54 = vld [vmem:[#allocation57_spill] sm:$0xff] }
 0x3c3   :  { %2687 = vmatpush1.bf16.msra.mxu1 %v5775_v55  ;;  %2542 = vmatprep.subr.bf16.mxu0 %v5776_v56  ;;  %v5803_v55 = vld [vmem:[#allocation58_spill] sm:$0xff]  ;;  %v5804_v56 = vld [vmem:[#allocation59_spill] sm:$0xff] }
 0x3c4   :  { %2688 = vmatprep.subr.bf16.mxu1 %v5777_v57  ;;  %v5805_v57 = vld [vmem:[#allocation60_spill] sm:$0xff] }
 0x3c6   :  { %2543 = vmatpush1.bf16.msra.mxu0 %v5778_v58  ;;  %v5806_v58 = vld [vmem:[#allocation61_spill] sm:$0xff] }
 0x3c7   :  { %2689 = vmatpush1.bf16.msra.mxu1 %v5779_v59  ;;  %2544 = vmatprep.subr.bf16.mxu0 %v5780_v41  ;;  %v5807_v59 = vld [vmem:[#allocation73_spill] sm:$0xff]  ;;  %v5808_v41 = vld [vmem:[#allocation62_spill] sm:$0xff] }
 0x3c8   :  { %2690 = vmatprep.subr.bf16.mxu1 %v5781_v44  ;;  %v5809_v44 = vld [vmem:[#allocation63_spill] sm:$0xff] }
 0x3ca   :  { %2545 = vmatpush1.bf16.msra.mxu0 %v5782_v42  ;;  %v5810_v42 = vld [vmem:[#allocation64_spill] sm:$0xff] }
 0x3cb   :  { %2691 = vmatpush1.bf16.msra.mxu1 %v5783_v22  ;;  %2546 = vmatprep.subr.bf16.mxu0 %v5784_v23  ;;  %v5811_v22 = vld [vmem:[#allocation65_spill] sm:$0xff]  ;;  %v5812_v23 = vld [vmem:[#allocation66_spill] sm:$0xff] }
 0x3cc   :  { %2692 = vmatprep.subr.bf16.mxu1 %v5785_v24  ;;  %v5813_v24 = vld [vmem:[#allocation68_spill] sm:$0xff] }
 0x3ce   :  { %2547 = vmatpush1.bf16.msra.mxu0 %v5786_v28  ;;  %v5814_v28 = vld [vmem:[#allocation69_spill] sm:$0xff] }
 0x3cf   :  { %2693 = vmatpush1.bf16.msra.mxu1 %v5787_v29  ;;  %2548 = vmatprep.subr.bf16.mxu0 %v5788_v31  ;;  %v5815_v29 = vld [vmem:[#allocation71_spill] sm:$0xff]  ;;  %v5816_v31 = vld [vmem:[#allocation72_spill] sm:$0xff] }
 0x3d0   :  { %2694 = vmatprep.subr.bf16.mxu1 %v5789_v32  ;;  %v5818_v32 = vld [vmem:[#allocation76_spill] sm:$0xff] }
 0x3d2   :  { %2549 = vmatpush1.bf16.msra.mxu0 %v5790_v37  ;;  %v1201_v37 = vld [vmem:[%s5566_s18 + $0x118] sm:$0xff] }
 0x3d3   :  { %2695 = vmatpush1.bf16.msra.mxu1 %v5791_v38  ;;  %2550 = vmatprep.subr.bf16.mxu0 %v5792_v39  ;;  %v1186_v38 = vld [vmem:[%s5566_s18 + $0xa0] sm:$0xff]  ;;  %v1187_v39 = vld [vmem:[%s5566_s18 + $0xa8] sm:$0xff] }
 0x3d4   :  { %2696 = vmatprep.subr.bf16.mxu1 %v5793_v40  ;;  %v5833_v40 = vld [vmem:[#allocation81_spill] sm:$0xff] }
 0x3d6   :  { %2551 = vmatpush1.bf16.msra.mxu0 %v5794_v45  ;;  %v1218_v45 = vld [vmem:[%s5566_s18 + $0x1a0] sm:$0xff] }
 0x3d7   :  { %2697 = vmatpush1.bf16.msra.mxu1 %v5795_v46  ;;  %2593 = vmatprep.subr.bf16.mxu0 %v5796_v47  ;;  %v1219_v46 = vld [vmem:[%s5566_s18 + $0x1a8] sm:$0xff] }
 0x3d8   :  { %2739 = vmatprep.subr.bf16.mxu1 %v5797_v48 }
 0x3d9   :  { %2553 = vmatmul.mubr.bf16.vlgmr.msra.gmra.mrb[20].mxu0 %v5798_v49 }
 0x3da   :  { %2699 = vmatmul.mubr.bf16.vlgmr.msra.gmra.mrb[20].mxu1 %v5798_v49  ;;  %2562 = vmatprep.mubr.bf16.mxu0 %v5799_v50  ;;  %v5236_v49 = vpack.c.bf16 %v1187_v39, %v1186_v38 }
 0x3db   :  { %2594 = vmatpush1.bf16.msra.mxu0 %v5800_v51  ;;  %2708 = vmatprep.mubr.bf16.mxu1 %v5799_v50  ;;  %v1170_v50 = vld [vmem:[%s5566_s18 + $0x20] sm:$0xff]  ;;  %v1171_v51 = vld [vmem:[%s5566_s18 + $0x28] sm:$0xff] }
 0x3dc   :  { %2740 = vmatpush1.bf16.msra.mxu1 %v5801_v53  ;;  %2595 = vmatprep.subr.bf16.mxu0 %v5802_v54  ;;  %v1202_v53 = vld [vmem:[%s5566_s18 + $0x120] sm:$0xff]  ;;  %v5248_v54 = vpack.c.bf16 %v1219_v46, %v1218_v45  ;;  %v1179_v45 = vld [vmem:[%s5566_s18 + $0x68] sm:$0xff] }
 0x3dd   :  { %2741 = vmatprep.subr.bf16.mxu1 %v5803_v55  ;;  %v1203_v55 = vld [vmem:[%s5566_s18 + $0x128] sm:$0xff]  ;;  %v1210_v46 = vld [vmem:[%s5566_s18 + $0x160] sm:$0xff] }
 0x3df   :  { %2596 = vmatpush1.bf16.msra.mxu0 %v5804_v56  ;;  %v1188_v56 = vld [vmem:[%s5566_s18 + $0xb0] sm:$0xff] }
 0x3e0   :  { %2742 = vmatpush1.bf16.msra.mxu1 %v5805_v57  ;;  %2597 = vmatprep.subr.bf16.mxu0 %v5806_v58  ;;  %v1189_v57 = vld [vmem:[%s5566_s18 + $0xb8] sm:$0xff]  ;;  %v1220_v58 = vld [vmem:[%s5566_s18 + $0x1b0] sm:$0xff] }
 0x3e1   :  { %2563 = vmatmul.mubr.bf16.gmra.mrb[24].mxu0 %v5807_v59  ;;  %2743 = vmatprep.subr.bf16.mxu1 %v5808_v41  ;;  %v5266_v41 = vpack.c.bf16 %v1171_v51, %v1170_v50  ;;  %v1211_v51 = vld [vmem:[%s5566_s18 + $0x168] sm:$0xff] }
 0x3e2   :  { %2709 = vmatmul.mubr.bf16.gmra.mrb[24].mxu1 %v5807_v59  ;;  %2572 = vmatprep.mubr.bf16.mxu0 %v4802_v52  ;;  %v1221_v59 = vld [vmem:[%s5566_s18 + $0x1b8] sm:$0xff] }
 0x3e3   :  { %2598 = vmatpush1.bf16.msra.mxu0 %v5809_v44  ;;  %2718 = vmatprep.mubr.bf16.mxu1 %v4802_v52  ;;  %v5817_v52 = vld [vmem:[#allocation74_spill] sm:$0xff]  ;;  %v5270_v44 = vpack.c.bf16 %v1203_v55, %v1202_v53  ;;  %v1197_v55 = vld [vmem:[%s5566_s18 + $0xf8] sm:$0xff] }
 0x3e4   :  { %2744 = vmatpush1.bf16.msra.mxu1 %v5810_v42  ;;  %2599 = vmatprep.subr.bf16.mxu0 %v5811_v22  ;;  %v5272_v42 = vpack.c.bf16 %v1189_v57, %v1188_v56  ;;  %v1172_v22 = vld [vmem:[%s5566_s18 + $0x30] sm:$0xff]  ;;  %v1229_v57 = vld [vmem:[%s5566_s18 + $0x1f8] sm:$0xff] }
 0x3e5   :  { %2745 = vmatprep.subr.bf16.mxu1 %v5812_v23  ;;  %v1173_v23 = vld [vmem:[%s5566_s18 + $0x38] sm:$0xff]  ;;  %v1196_v53 = vld [vmem:[%s5566_s18 + $0xf0] sm:$0xff] }
 0x3e6   :  { %v1228_v56 = vld [vmem:[%s5566_s18 + $0x1f0] sm:$0xff] }
 0x3e7   :  { %2600 = vmatpush1.bf16.msra.mxu0 %v5813_v24  ;;  %v1204_v24 = vld [vmem:[%s5566_s18 + $0x130] sm:$0xff] }
 0x3e8   :  { %2746 = vmatpush1.bf16.msra.mxu1 %v5814_v28  ;;  %2601 = vmatprep.subr.bf16.mxu0 %v5815_v29  ;;  %v5834_v28 = vld [vmem:[#allocation82_spill] sm:$0xff]  ;;  %v5285_v29 = vpack.c.bf16 %v1221_v59, %v1220_v58  ;;  %v5422_v59 = vpack.c.bf16 %v1211_v51, %v1210_v46 }
 0x3e9   :  { %2573 = vmatmul.mubr.bf16.gmra.mrb[28].mxu0 %v4806_v11  ;;  %2747 = vmatprep.subr.bf16.mxu1 %v5816_v31  ;;  %v1205_v31 = vld [vmem:[%s5566_s18 + $0x138] sm:$0xff] }
 0x3ea   :  { %2719 = vmatmul.mubr.bf16.gmra.mrb[28].mxu1 %v4806_v11  ;;  %2582 = vmatprep.mubr.bf16.mxu0 %v4830_v63  ;;  %v5819_v11 = vld [vmem:[#allocation75_spill] sm:$0xff] }
 0x3eb   :  { %2602 = vmatpush1.bf16.msra.mxu0 %v4788_v3  ;;  %2728 = vmatprep.mubr.bf16.mxu1 %v4830_v63  ;;  %v5820_v3 = vld [vmem:[#allocation77_spill] sm:$0xff]  ;;  %v5826_v63 = vld [vmem:[#allocation90_spill] sm:$0xff] }
 0x3ec   :  { %2748 = vmatpush1.bf16.msra.mxu1 %v4790_v36  ;;  %2603 = vmatprep.subr.bf16.mxu0 %v4798_v19  ;;  %v5821_v19 = vld [vmem:[#allocation78_spill] sm:$0xff]  ;;  %v5822_v36 = vld [vmem:[#allocation79_spill] sm:$0xff] }
 0x3ed   :  { %2749 = vmatprep.subr.bf16.mxu1 %v5817_v52  ;;  %v1190_v52 = vld [vmem:[%s5566_s18 + $0xc0] sm:$0xff] }
 0x3ef   :  { %2604 = vmatpush1.bf16.msra.mxu0 %v4815_v17  ;;  %v5823_v17 = vld [vmem:[#allocation87_spill] sm:$0xff] }
 0x3f0   :  { %2750 = vmatpush1.bf16.msra.mxu1 %v4817_v27  ;;  %2605 = vmatprep.subr.bf16.mxu0 %v4826_v33  ;;  %v5824_v27 = vld [vmem:[#allocation88_spill] sm:$0xff]  ;;  %v5825_v33 = vld [vmem:[#allocation89_spill] sm:$0xff] }
 0x3f1   :  { %2583 = vmatmul.mubr.bf16.gmra.mrb[32].mxu0 %v5818_v32  ;;  %2751 = vmatprep.subr.bf16.mxu1 %v5819_v11  ;;  %v5835_v11 = vld [vmem:[#allocation83_spill] sm:$0xff] }
 0x3f2   :  { %2729 = vmatmul.mubr.bf16.gmra.mrb[32].mxu1 %v5818_v32  ;;  %2625 = vmatprep.mubr.bf16.mxu0 %v5820_v3  ;;  %v1191_v32 = vld [vmem:[%s5566_s18 + $0xc8] sm:$0xff] }
 0x3f3   :  { %2606 = vmatpush1.bf16.msra.mxu0 %v4847_v60  ;;  %2771 = vmatprep.mubr.bf16.mxu1 %v5820_v3  ;;  %v5827_v60 = vld [vmem:[#allocation91_spill] sm:$0xff]  ;;  %v1222_v3 = vld [vmem:[%s5566_s18 + $0x1c0] sm:$0xff] }
 0x3f4   :  { %2752 = vmatpush1.bf16.msra.mxu1 %v4849_v18  ;;  %2607 = vmatprep.subr.bf16.mxu0 %v5821_v19  ;;  %v5828_v18 = vld [vmem:[#allocation92_spill] sm:$0xff]  ;;  %v1223_v19 = vld [vmem:[%s5566_s18 + $0x1c8] sm:$0xff] }
 0x3f5   :  { %2753 = vmatprep.subr.bf16.mxu1 %v5822_v36  ;;  %v5306_v36 = vpack.c.bf16 %v1173_v23, %v1172_v22  ;;  %v5424_v22 = vpack.c.bf16 %v1197_v55, %v1196_v53  ;;  %v1180_v23 = vld [vmem:[%s5566_s18 + $0x70] sm:$0xff] }
 0x3f7   :  { %2608 = vmatpush1.bf16.msra.mxu0 %v4874_v6  ;;  %v5829_v6 = vld [vmem:[#allocation93_spill] sm:$0xff] }
 0x3f8   :  { %2754 = vmatpush1.bf16.msra.mxu1 %v4876_v43  ;;  %2609 = vmatprep.subr.bf16.mxu0 %v4885_v13  ;;  %v5830_v43 = vld [vmem:[#allocation94_spill] sm:$0xff]  ;;  %v5831_v13 = vld [vmem:[#allocation95_spill] sm:$0xff] }
 0x3f9   :  { %2755 = vmatprep.subr.bf16.mxu1 %v4887_v14  ;;  %v1182_v14 = vld [vmem:[%s5566_s18 + $0x80] sm:$0xff] }
 0x3fb   :  { %2610 = vmatpush1.bf16.msra.mxu0 %v4904_v10  ;;  %v1183_v10 = vld [vmem:[%s5566_s18 + $0x88] sm:$0xff] }
 0x3fc   :  { %2756 = vmatpush1.bf16.msra.mxu1 %v4906_v9  ;;  %2611 = vmatprep.subr.bf16.mxu0 %v4912_v35  ;;  %v1214_v9 = vld [vmem:[%s5566_s18 + $0x180] sm:$0xff]  ;;  %v1215_v35 = vld [vmem:[%s5566_s18 + $0x188] sm:$0xff] }
 0x3fd   :  { %2757 = vmatprep.subr.bf16.mxu1 %v4914_v16  ;;  %v5163_v16 = vpack.c.bf16 %v1215_v35, %v1214_v9 }
 0x3ff   :  { %2612 = vmatpush1.bf16.msra.mxu0 %v4922_v30  ;;  %v1166_v30 = vld [vmem:[%s5566_s18] sm:$0xff] }
 0x400   :  { %2758 = vmatpush1.bf16.msra.mxu1 %v4924_v2  ;;  %2613 = vmatprep.subr.bf16.mxu0 %v4930_v4  ;;  %v1167_v2 = vld [vmem:[%s5566_s18 + $0x8] sm:$0xff]  ;;  %v1185_v4 = vld [vmem:[%s5566_s18 + $0x98] sm:$0xff] }
 0x401   :  { %2759 = vmatprep.subr.bf16.mxu1 %v4932_v12  ;;  %v1216_v12 = vld [vmem:[%s5566_s18 + $0x190] sm:$0xff] }
 0x403   :  { %2614 = vmatpush1.bf16.msra.mxu0 %v4936_v20  ;;  %v1217_v20 = vld [vmem:[%s5566_s18 + $0x198] sm:$0xff] }
 0x404   :  { %2760 = vmatpush1.bf16.msra.mxu1 %v4938_v5  ;;  %2615 = vmatprep.subr.bf16.mxu0 %v4942_v15  ;;  %v5192_v5 = vpack.c.bf16 %v1167_v2, %v1166_v30  ;;  %v1176_v2 = vld [vmem:[%s5566_s18 + $0x50] sm:$0xff] }
 0x405   :  { %2761 = vmatprep.subr.bf16.mxu1 %v4944_v1 }
 0x407   :  { %2616 = vmatpush1.bf16.msra.mxu0 %v4948_v26  ;;  %v1169_v26 = vld [vmem:[%s5566_s18 + $0x18] sm:$0xff] }
 0x408   :  { %2762 = vmatpush1.bf16.msra.mxu1 %v4950_v25  ;;  %2617 = vmatprep.subr.bf16.mxu0 %v5823_v17  ;;  %v5832_v25 = vld [vmem:[#allocation80_spill] sm:$0xff]  ;;  %v5310_v17 = vpack.c.bf16 %v1205_v31, %v1204_v24  ;;  %v5434_v31 = vpack.c.bf16 %v1229_v57, %v1228_v56 }
 0x409   :  { %2763 = vmatprep.subr.bf16.mxu1 %v5824_v27  ;;  %v5312_v27 = vpack.c.bf16 %v1191_v32, %v1190_v52  ;;  %v1181_v24 = vld [vmem:[%s5566_s18 + $0x78] sm:$0xff]  ;;  %v1212_v52 = vld [vmem:[%s5566_s18 + $0x170] sm:$0xff] }
 0x40a   :  { %v1213_v32 = vld [vmem:[%s5566_s18 + $0x178] sm:$0xff] }
 0x40b   :  { %2618 = vmatpush1.bf16.msra.mxu0 %v5825_v33  ;;  %v1174_v33 = vld [vmem:[%s5566_s18 + $0x40] sm:$0xff] }
 0x40c   :  { %2764 = vmatpush1.bf16.msra.mxu1 %v5826_v63  ;;  %2619 = vmatprep.subr.bf16.mxu0 %v5827_v60  ;;  %v1175_v63 = vld [vmem:[%s5566_s18 + $0x48] sm:$0xff]  ;;  %v1206_v60 = vld [vmem:[%s5566_s18 + $0x140] sm:$0xff] }
 0x40d   :  { %2765 = vmatprep.subr.bf16.mxu1 %v5828_v18  ;;  %v5324_v18 = vpack.c.bf16 %v1223_v19, %v1222_v3  ;;  %v5342_v9 = vpack.c.bf16 %v1175_v63, %v1174_v33  ;;  %v5448_v3 = vpack.c.bf16 %v1213_v32, %v1212_v52  ;;  %v1165_v19 = vld [vmem:[%s5565_s17] sm:$0xf]  ;;  %v5839_v33 = vld [vmem:[#allocation51_spill] sm:$0xff]  ;;  %s4110_s17 = smov [#allocation6]  }
 0x40e   :  { %v5459_v63 = vrot.slane %v1165_v19, %v5839_v33  ;;  %s3189_s26 = sshll.u32 %s4110_s17, 4  ;;  %s3190_s26 = int_to_ptr.vmem [resolvable:$true] %s3189_s26 }
 0x40f   :  { %2620 = vmatpush1.bf16.msra.mxu0 %v5829_v6  ;;  %v1207_v6 = vld [vmem:[%s5566_s18 + $0x148] sm:$0xff]  ;;  %s4076_s27 = scalar_lea.vmem %s3190_s26, 16  ;;  %s4080_s28 = scalar_lea.vmem %s3190_s26, 32 }
 0x410   :  { %2766 = vmatpush1.bf16.msra.mxu1 %v5830_v43  ;;  %2621 = vmatprep.subr.bf16.mxu0 %v4978_v62  ;;  %v5160_v62 = vpack.c.bf16 %v1183_v10, %v1182_v14  ;;  %v1192_v43 = vld [vmem:[%s5566_s18 + $0xd0] sm:$0xff]  ;;  %v1225_v10 = vld [vmem:[%s5566_s18 + $0x1d8] sm:$0xff]  ;;  %v5346_v35 = vpack.c.bf16 %v1207_v6, %v1206_v60  ;;  %p4077_p8 = scmp.ne.s32.totalorder %s3190_s26, %s4076_s27  ;;  %p4081_p9 = scmp.lt.s32.totalorder %s3190_s26, %s3190_s26 }
 0x411   :  { %2767 = vmatprep.subr.bf16.mxu1 %v5831_v13  ;;  %v1193_v13 = vld [vmem:[%s5566_s18 + $0xd8] sm:$0xff]  ;;  %v1224_v14 = vld [vmem:[%s5566_s18 + $0x1d0] sm:$0xff]  ;;  %p4082_p10 = scmp.lt.s32.totalorder %s4080_s28, %s4076_s27 }
 0x412   :  { %v5348_v30 = vpack.c.bf16 %v1193_v13, %v1192_v43  ;;  %v5840_v60 = vld [vmem:[#allocation52_spill] sm:$0xff]  ;;  %v5841_v43 = vld [vmem:[#allocation53_spill] sm:$0xff] }
 0x413   :  { %2622 = vmatpush1.bf16.msra.mxu0 %v4984_v7  ;;  %v5209_v7 = vpack.c.bf16 %v1217_v20, %v1216_v12  ;;  %v1209_v12 = vld [vmem:[%s5566_s18 + $0x158] sm:$0xff]  ;;  %v1194_v20 = vld [vmem:[%s5566_s18 + $0xe0] sm:$0xff]  ;;  %v5462_v6 = vrot.slane %v1165_v19, %v5840_v60  ;;  %v5465_v13 = vrot.slane %v1165_v19, %v5841_v43  ;;  %p4083_p11 = por %p4082_p10, %p4081_p9 }
 0x414   :  { %2768 = vmatpush1.bf16.msra.mxu1 %v4986_v34  ;;  %2623 = vmatprep.subr.bf16.mxu0 %v4990_v21  ;;  %v1198_v34 = vld [vmem:[%s5566_s18 + $0x100] sm:$0xff]  ;;  %v1199_v21 = vld [vmem:[%s5566_s18 + $0x108] sm:$0xff] }
 0x415   :  { %2769 = vmatprep.subr.bf16.mxu1 %v4992_v8  ;;  %v1184_v8 = vld [vmem:[%s5566_s18 + $0x90] sm:$0xff]  ;;  %v5195_v15 = vpack.c.bf16 %v1199_v21, %v1198_v34  ;;  %v1177_v34 = vld [vmem:[%s5566_s18 + $0x58] sm:$0xff]  ;;  %p4084_p12 = pnand %p4083_p11, %p4077_p8 }
 0x416   :  { %v5197_v1 = vpack.c.bf16 %v1185_v4, %v1184_v8  ;;  %v1208_v21 = vld [vmem:[%s5566_s18 + $0x150] sm:$0xff]  ;;  %v5836_v8 = vld [vmem:[#allocation84_spill] sm:$0xff]  ;;  %v5361_v4 = vpack.c.bf16 %v1225_v10, %v1224_v14 }
 0x417   :  { %2624 = vmatpush1.bf16.msra.mxu0 %v4996_v0  ;;  %v1168_v0 = vld [vmem:[%s5566_s18 + $0x10] sm:$0xff]  ;;  %v5386_v38 = vpack.c.bf16 %v1209_v12, %v1208_v21 }
 0x418   :  { %2770 = vmatpush1.bf16.msra.mxu1 %v4998_v61  ;;  %3620 = vmatprep.subr.bf16.mxu0 %v5160_v62  ;;  %v1200_v61 = vld [vmem:[%s5566_s18 + $0x110] sm:$0xff]  ;;  %v5230_v47 = vpack.c.bf16 %v1169_v26, %v1168_v0  ;;  %v1195_v0 = vld [vmem:[%s5566_s18 + $0xe8] sm:$0xff] }
 0x419   :  { %3652 = vmatprep.subr.bf16.mxu1 %v5163_v16  ;;  %v5234_v48 = vpack.c.bf16 %v1201_v37, %v1200_v61  ;;  %v5837_v26 = vld [vmem:[#allocation85_spill] sm:$0xff]  ;;  %v5382_v37 = vpack.c.bf16 %v1177_v34, %v1176_v2  ;;  %v5388_v39 = vpack.c.bf16 %v1195_v0, %v1194_v20  ;;  %v5842_v14 = vld [vmem:[#allocation54_spill] sm:$0xff] }
 0x41a   :  { %2626 = vmatmul.mubr.bf16.vlgmr.msra.gmra.mrb[20].mxu0 %v5832_v25  ;;  %v1226_v61 = vld [vmem:[%s5566_s18 + $0x1e0] sm:$0xff]  ;;  %v5468_v10 = vrot.slane %v1165_v19, %v5842_v14 }
 0x41b   :  { %2772 = vmatmul.mubr.bf16.vlgmr.msra.gmra.mrb[20].mxu1 %v5832_v25  ;;  %2635 = vmatprep.mubr.bf16.mxu0 %v5833_v40  ;;  %v1227_v25 = vld [vmem:[%s5566_s18 + $0x1e8] sm:$0xff] }
 0x41c   :  { %2781 = vmatprep.mubr.bf16.mxu1 %v5833_v40  ;;  %3622 = vmatpush3.bf16.msra.mxu0 %v5192_v5  ;;  %v1178_v40 = vld [vmem:[%s5566_s18 + $0x60] sm:$0xff]  ;;  %v5400_v50 = vpack.c.bf16 %v1227_v25, %v1226_v61 }
 0x41d   :  { %3654 = vmatpush3.bf16.msra.mxu1 %v5195_v15  ;;  %3624 = vmatprep.subr.bf16.mxu0 %v5197_v1  ;;  %v5418_v58 = vpack.c.bf16 %v1179_v45, %v1178_v40 }
 0x41e   :  { %3656 = vmatprep.subr.bf16.mxu1 %v5209_v7 }
 0x420   :  { %3626 = vmatpush3.bf16.msra.mxu0 %v5230_v47 }
 0x421   :  { %3658 = vmatpush3.bf16.msra.mxu1 %v5234_v48  ;;  %3628 = vmatprep.subr.bf16.mxu0 %v5236_v49 }
 0x422   :  { %2636 = vmatmul.mubr.bf16.gmra.mrb[24].mxu0 %v5834_v28  ;;  %3660 = vmatprep.subr.bf16.mxu1 %v5248_v54 }
 0x423   :  { %2782 = vmatmul.mubr.bf16.gmra.mrb[24].mxu1 %v5834_v28  ;;  %2645 = vmatprep.mubr.bf16.mxu0 %v5835_v11  ;;  %v5838_v28 = vld [vmem:[#allocation86_spill] sm:$0xff] }
 0x424   :  { %2791 = vmatprep.mubr.bf16.mxu1 %v5835_v11  ;;  %3630 = vmatpush3.bf16.msra.mxu0 %v5266_v41  ;;  %v5444_v11 = vpack.c.bf16 %v1181_v24, %v1180_v23 }
 0x425   :  { %3662 = vmatpush3.bf16.msra.mxu1 %v5270_v44  ;;  %3632 = vmatprep.subr.bf16.mxu0 %v5272_v42 }
 0x426   :  { %3664 = vmatprep.subr.bf16.mxu1 %v5285_v29 }
 0x428   :  { %3634 = vmatpush3.bf16.msra.mxu0 %v5306_v36 }
 0x429   :  { %3666 = vmatpush3.bf16.msra.mxu1 %v5310_v17  ;;  %3636 = vmatprep.subr.bf16.mxu0 %v5312_v27 }
 0x42a   :  { %2646 = vmatmul.mubr.bf16.gmra.mrb[28].mxu0 %v5836_v8  ;;  %3668 = vmatprep.subr.bf16.mxu1 %v5324_v18 }
 0x42b   :  { %2792 = vmatmul.mubr.bf16.gmra.mrb[28].mxu1 %v5836_v8  ;;  %2655 = vmatprep.mubr.bf16.mxu0 %v5837_v26 }
 0x42c   :  { %2801 = vmatprep.mubr.bf16.mxu1 %v5837_v26  ;;  %3638 = vmatpush3.bf16.msra.mxu0 %v5342_v9 }
 0x42d   :  { %3670 = vmatpush3.bf16.msra.mxu1 %v5346_v35  ;;  %3640 = vmatprep.subr.bf16.mxu0 %v5348_v30 }
 0x42e   :  { %3672 = vmatprep.subr.bf16.mxu1 %v5361_v4 }
 0x430   :  { %3642 = vmatpush3.bf16.msra.mxu0 %v5382_v37 }
 0x431   :  { %3674 = vmatpush3.bf16.msra.mxu1 %v5386_v38  ;;  %3644 = vmatprep.subr.bf16.mxu0 %v5388_v39 }
 0x432   :  { %2656 = vmatmul.mubr.bf16.gmra.mrb[32].mxu0 %v5838_v28  ;;  %3676 = vmatprep.subr.bf16.mxu1 %v5400_v50 }
 0x433   :  { %2802 = vmatmul.mubr.bf16.gmra.mrb[32].mxu1 %v5838_v28 }
 0x434   :  { %3646 = vmatpush3.bf16.msra.mxu0 %v5418_v58 }
 0x435   :  { %3678 = vmatpush3.bf16.msra.mxu1 %v5422_v59  ;;  %3648 = vmatprep.subr.bf16.mxu0 %v5424_v22 }
 0x436   :  { %3680 = vmatprep.subr.bf16.mxu1 %v5434_v31 }
 0x438   :  { %3650 = vmatpush3.bf16.msra.mxu0 %v5444_v11 }
 0x439   :  { %3682 = vmatpush3.bf16.msra.mxu1 %v5448_v3  ;;  %3684 = vmatprep.subr.bf16.mxu0 %v5160_v62 }
 0x43a   :  { %3716 = vmatprep.subr.bf16.mxu1 %v5163_v16 }
 0x46c   :  { %v1979_v2 = vpop.f32.mrb[16].mxu0 }
 0x46d   :  { %v2061_v62 = vpop.f32.mrb[16].mxu1  ;;  %v3747_v16 = vadd.f32 %v1979_v2, %v5459_v63  ;;  %v1981_v21 = vpop.f32.mrb[17].mxu0 }
 0x46e   :  { %v3749_v34 = vadd.f32 %v2061_v62, %v5462_v6  ;;  %v2063_v8 = vpop.f32.mrb[17].mxu1  ;;  %v3748_v12 = vadd.f32 %v1981_v21, %v5465_v13  ;;  %v1983_v0 = vpop.f32.mrb[18].mxu0 }
 0x46f   :  { %v3750_v20 = vadd.f32 %v2063_v8, %v5468_v10  ;;  %v2065_v26 = vpop.f32.mrb[18].mxu1  ;;  %v2068_v61 = vmax.f32 %v3747_v16, 0.0  ;;  %v1984_v40 = vpop.f32.mrb[19].mxu0 }
 0x470   :  { %v2070_v25 = vmax.f32 %v3749_v34, 0.0  ;;  %v2066_v45 = vpop.f32.mrb[19].mxu1  ;;  %v2069_v46 = vmax.f32 %v3748_v12, 0.0 }
 0x471   :  { %v2071_v51 = vmax.f32 %v3750_v20, 0.0  ;;  %v2072_v53 = vrot.slane %v2068_v61, 4 }
 0x472   :  { %v2084_v55 = vrot.slane %v2070_v25, 4  ;;  %v2078_v56 = vrot.slane %v2069_v46, 4 }
 0x473   :  { %v2090_v57 = vrot.slane %v2071_v51, 4  ;;  %v2073_v23 = vadd.f32 %v2072_v53, %v2068_v61 }
 0x474   :  { %v2085_v24 = vadd.f32 %v2084_v55, %v2070_v25  ;;  %v2079_v28 = vadd.f32 %v2078_v56, %v2069_v46 }
 0x475   :  { %v2091_v52 = vadd.f32 %v2090_v57, %v2071_v51  ;;  %v2074_v32 = vrot.slane %v2073_v23, 2 }
 0x476   :  { %v2086_v19 = vrot.slane %v2085_v24, 2  ;;  %v2080_v33 = vrot.slane %v2079_v28, 2 }
 0x477   :  { %v2092_v60 = vrot.slane %v2091_v52, 2  ;;  %v2075_v43 = vadd.f32 %v2074_v32, %v2073_v23 }
 0x478   :  { %v2087_v14 = vadd.f32 %v2086_v19, %v2085_v24  ;;  %v2081_v2 = vadd.f32 %v2080_v33, %v2079_v28 }
 0x479   :  { %v2093_v62 = vadd.f32 %v2092_v60, %v2091_v52  ;;  %v2076_v16 = vrot.slane %v2075_v43, 1 }
 0x47a   :  { %v2088_v34 = vrot.slane %v2087_v14, 1  ;;  %v2082_v21 = vrot.slane %v2081_v2, 1 }
 0x47b   :  { %v2094_v8 = vrot.slane %v2093_v62, 1  ;;  %v2077_v0 = vadd.f32 %v2076_v16, %v2075_v43 }
 0x47c   :  { %v2083_v12 = vadd.f32 %v2082_v21, %v2081_v2  ;;  %v2089_v26 = vadd.f32 %v2088_v34, %v2087_v14 }
 0x47d   :  { %v2095_v20 = vadd.f32 %v2094_v8, %v2093_v62 }
 0x47e   :  { %2960 = vmatprep.mubr.f32.mxu0 %v2083_v12 }
 0x47f   :  { %3030 = vmatprep.mubr.f32.mxu1 %v2095_v20  ;;  %2961 = vmatmul.mubr.f32.vlgmr.msra.gmra.mrb[36].mxu0 %v2077_v0 }
 0x480   :  { %3031 = vmatmul.mubr.f32.vlgmr.msra.gmra.mrb[36].mxu1 %v2089_v26  ;;  %3686 = vmatpush3.bf16.msra.mxu0 %v5192_v5 }
 0x481   :  { %3718 = vmatpush3.bf16.msra.mxu1 %v5195_v15  ;;  %3688 = vmatprep.subr.bf16.mxu0 %v5197_v1 }
 0x482   :  { %3720 = vmatprep.subr.bf16.mxu1 %v5209_v7 }
 0x484   :  { %3690 = vmatpush3.bf16.msra.mxu0 %v5230_v47 }
 0x485   :  { %3722 = vmatpush3.bf16.msra.mxu1 %v5234_v48  ;;  %3692 = vmatprep.subr.bf16.mxu0 %v5236_v49 }
 0x486   :  { %3724 = vmatprep.subr.bf16.mxu1 %v5248_v54 }
 0x488   :  { %3694 = vmatpush3.bf16.msra.mxu0 %v5266_v41 }
 0x489   :  { %3726 = vmatpush3.bf16.msra.mxu1 %v5270_v44  ;;  %3696 = vmatprep.subr.bf16.mxu0 %v5272_v42 }
 0x48a   :  { %3728 = vmatprep.subr.bf16.mxu1 %v5285_v29 }
 0x48c   :  { %3698 = vmatpush3.bf16.msra.mxu0 %v5306_v36 }
 0x48d   :  { %3730 = vmatpush3.bf16.msra.mxu1 %v5310_v17  ;;  %3700 = vmatprep.subr.bf16.mxu0 %v5312_v27 }
 0x48e   :  { %3732 = vmatprep.subr.bf16.mxu1 %v5324_v18 }
 0x490   :  { %3702 = vmatpush3.bf16.msra.mxu0 %v5342_v9 }
 0x491   :  { %3734 = vmatpush3.bf16.msra.mxu1 %v5346_v35  ;;  %3704 = vmatprep.subr.bf16.mxu0 %v5348_v30 }
 0x492   :  { %3736 = vmatprep.subr.bf16.mxu1 %v5361_v4 }
 0x494   :  { %3706 = vmatpush3.bf16.msra.mxu0 %v5382_v37 }
 0x495   :  { %3738 = vmatpush3.bf16.msra.mxu1 %v5386_v38  ;;  %3708 = vmatprep.subr.bf16.mxu0 %v5388_v39 }
 0x496   :  { %3740 = vmatprep.subr.bf16.mxu1 %v5400_v50 }
 0x498   :  { %3710 = vmatpush3.bf16.msra.mxu0 %v5418_v58 }
 0x499   :  { %3742 = vmatpush3.bf16.msra.mxu1 %v5422_v59  ;;  %3712 = vmatprep.subr.bf16.mxu0 %v5424_v22 }
 0x49a   :  { %3744 = vmatprep.subr.bf16.mxu1 %v5434_v31 }
 0x49c   :  { %3714 = vmatpush3.bf16.msra.mxu0 %v5444_v11 }
 0x49d   :  { %3746 = vmatpush3.bf16.msra.mxu1 %v5448_v3 }
 0x4ed   :  { %v2627_v5 = vpop.f32.mrb[20].mxu0 }
 0x4ee   :  { %v3751_v15 = vadd.f32 %v2627_v5, %v5459_v63  ;;  %v2773_v1 = vpop.f32.mrb[20].mxu1  ;;  %v2629_v7 = vpop.f32.mrb[21].mxu0 }
 0x4ef   :  { %v3767_v47 = vadd.f32 %v2773_v1, %v5462_v6  ;;  %v3752_v48 = vadd.f32 %v2629_v7, %v5465_v13  ;;  %v2775_v49 = vpop.f32.mrb[21].mxu1  ;;  %v2631_v54 = vpop.f32.mrb[22].mxu0 }
 0x4f0   :  { %v3768_v41 = vadd.f32 %v2775_v49, %v5468_v10  ;;  %v3753_v44 = vadd.f32 %v2631_v54, %v5459_v63  ;;  %v2777_v42 = vpop.f32.mrb[22].mxu1  ;;  %v2633_v29 = vpop.f32.mrb[23].mxu0  ;;  %v2812_v18 = vmax.f32 %v3751_v15, 0.0 }
 0x4f1   :  { %v3769_v36 = vadd.f32 %v2777_v42, %v5462_v6  ;;  %v3754_v17 = vadd.f32 %v2633_v29, %v5465_v13  ;;  %v2779_v27 = vpop.f32.mrb[23].mxu1  ;;  %v2814_v30 = vmax.f32 %v3767_v47, 0.0  ;;  %v2813_v4 = vmax.f32 %v3752_v48, 0.0 }
 0x4f2   :  { %v2816_v9 = vmax.f32 %v3753_v44, 0.0  ;;  %v3770_v35 = vadd.f32 %v2779_v27, %v5468_v10  ;;  %v2815_v39 = vmax.f32 %v3768_v41, 0.0 }
 0x4f3   :  { %v2818_v37 = vmax.f32 %v3769_v36, 0.0  ;;  %v2817_v38 = vmax.f32 %v3754_v17, 0.0 }
 0x4f4   :  { %v2844_v50 = vadd.f32 %v2816_v9, %v2812_v18  ;;  %v2819_v58 = vmax.f32 %v3770_v35, 0.0 }
 0x4f5   :  { %v2870_v59 = vadd.f32 %v2818_v37, %v2814_v30  ;;  %v2857_v22 = vadd.f32 %v2817_v38, %v2813_v4  ;;  %v2637_v31 = vpop.f32.mrb[24].mxu0 }
 0x4f6   :  { %v2883_v11 = vadd.f32 %v2819_v58, %v2815_v39  ;;  %v3755_v3 = vadd.f32 %v2637_v31, %v5459_v63  ;;  %v2783_v61 = vpop.f32.mrb[24].mxu1  ;;  %v2639_v25 = vpop.f32.mrb[25].mxu0 }
 0x4f7   :  { %v3771_v40 = vadd.f32 %v2783_v61, %v5462_v6  ;;  %v3756_v45 = vadd.f32 %v2639_v25, %v5465_v13  ;;  %v2785_v46 = vpop.f32.mrb[25].mxu1  ;;  %v2641_v51 = vpop.f32.mrb[26].mxu0 }
 0x4f8   :  { %v2820_v53 = vmax.f32 %v3755_v3, 0.0  ;;  %v3772_v55 = vadd.f32 %v2785_v46, %v5468_v10  ;;  %v3757_v56 = vadd.f32 %v2641_v51, %v5459_v63  ;;  %v2787_v57 = vpop.f32.mrb[26].mxu1  ;;  %v2643_v23 = vpop.f32.mrb[27].mxu0 }
 0x4f9   :  { %v2822_v24 = vmax.f32 %v3771_v40, 0.0  ;;  %v2821_v28 = vmax.f32 %v3756_v45, 0.0  ;;  %v3773_v52 = vadd.f32 %v2787_v57, %v5462_v6  ;;  %v3758_v32 = vadd.f32 %v2643_v23, %v5465_v13  ;;  %v2789_v19 = vpop.f32.mrb[27].mxu1 }
 0x4fa   :  { %v2845_v33 = vadd.f32 %v2844_v50, %v2820_v53  ;;  %v2823_v60 = vmax.f32 %v3772_v55, 0.0  ;;  %v2824_v43 = vmax.f32 %v3757_v56, 0.0  ;;  %v3774_v14 = vadd.f32 %v2789_v19, %v5468_v10 }
 0x4fb   :  { %v2871_v2 = vadd.f32 %v2870_v59, %v2822_v24  ;;  %v2858_v62 = vadd.f32 %v2857_v22, %v2821_v28  ;;  %v2826_v16 = vmax.f32 %v3773_v52, 0.0  ;;  %v2825_v34 = vmax.f32 %v3758_v32, 0.0 }
 0x4fc   :  { %v2884_v21 = vadd.f32 %v2883_v11, %v2823_v60  ;;  %v2846_v8 = vadd.f32 %v2845_v33, %v2824_v43  ;;  %v2827_v12 = vmax.f32 %v3774_v14, 0.0 }
 0x4fd   :  { %v2872_v20 = vadd.f32 %v2871_v2, %v2826_v16  ;;  %v2859_v0 = vadd.f32 %v2858_v62, %v2825_v34  ;;  %v2647_v26 = vpop.f32.mrb[28].mxu0 }
 0x4fe   :  { %v2885_v5 = vadd.f32 %v2884_v21, %v2827_v12  ;;  %v3759_v15 = vadd.f32 %v2647_v26, %v5459_v63  ;;  %v2793_v1 = vpop.f32.mrb[28].mxu1  ;;  %v2649_v7 = vpop.f32.mrb[29].mxu0 }
 0x4ff   :  { %v3775_v47 = vadd.f32 %v2793_v1, %v5462_v6  ;;  %v3760_v48 = vadd.f32 %v2649_v7, %v5465_v13  ;;  %v2795_v49 = vpop.f32.mrb[29].mxu1  ;;  %v2651_v54 = vpop.f32.mrb[30].mxu0 }
 0x500   :  { %v2828_v41 = vmax.f32 %v3759_v15, 0.0  ;;  %v3776_v44 = vadd.f32 %v2795_v49, %v5468_v10  ;;  %v3761_v42 = vadd.f32 %v2651_v54, %v5459_v63  ;;  %v2797_v29 = vpop.f32.mrb[30].mxu1  ;;  %v2653_v36 = vpop.f32.mrb[31].mxu0 }
 0x501   :  { %v2830_v17 = vmax.f32 %v3775_v47, 0.0  ;;  %v2829_v27 = vmax.f32 %v3760_v48, 0.0  ;;  %v3777_v18 = vadd.f32 %v2797_v29, %v5462_v6  ;;  %v3762_v9 = vadd.f32 %v2653_v36, %v5465_v13  ;;  %v2799_v35 = vpop.f32.mrb[31].mxu1 }
 0x502   :  { %v2847_v30 = vadd.f32 %v2846_v8, %v2828_v41  ;;  %v2831_v4 = vmax.f32 %v3776_v44, 0.0  ;;  %v2832_v37 = vmax.f32 %v3761_v42, 0.0  ;;  %v3778_v38 = vadd.f32 %v2799_v35, %v5468_v10 }
 0x503   :  { %v2873_v39 = vadd.f32 %v2872_v20, %v2830_v17  ;;  %v2860_v50 = vadd.f32 %v2859_v0, %v2829_v27  ;;  %v2834_v58 = vmax.f32 %v3777_v18, 0.0  ;;  %v2833_v59 = vmax.f32 %v3762_v9, 0.0 }
 0x504   :  { %v2886_v22 = vadd.f32 %v2885_v5, %v2831_v4  ;;  %v2848_v31 = vadd.f32 %v2847_v30, %v2832_v37  ;;  %v2835_v11 = vmax.f32 %v3778_v38, 0.0 }
 0x505   :  { %v2874_v3 = vadd.f32 %v2873_v39, %v2834_v58  ;;  %v2861_v61 = vadd.f32 %v2860_v50, %v2833_v59  ;;  %v2657_v25 = vpop.f32.mrb[32].mxu0 }
 0x506   :  { %v2887_v40 = vadd.f32 %v2886_v22, %v2835_v11  ;;  %v3763_v45 = vadd.f32 %v2657_v25, %v5459_v63  ;;  %v2803_v46 = vpop.f32.mrb[32].mxu1  ;;  %v2659_v51 = vpop.f32.mrb[33].mxu0 }
 0x507   :  { %v3779_v53 = vadd.f32 %v2803_v46, %v5462_v6  ;;  %v3764_v55 = vadd.f32 %v2659_v51, %v5465_v13  ;;  %v2805_v56 = vpop.f32.mrb[33].mxu1  ;;  %v2661_v57 = vpop.f32.mrb[34].mxu0 }
 0x508   :  { %v2836_v23 = vmax.f32 %v3763_v45, 0.0  ;;  %v3780_v24 = vadd.f32 %v2805_v56, %v5468_v10  ;;  %v3765_v28 = vadd.f32 %v2661_v57, %v5459_v63  ;;  %v2807_v52 = vpop.f32.mrb[34].mxu1  ;;  %v2663_v32 = vpop.f32.mrb[35].mxu0  ;;  %v1230_v57 = vld [vmem:[#allocation2] sm:$0x1] }
 0x509   :  { %v2838_v19 = vmax.f32 %v3779_v53, 0.0  ;;  %v2837_v33 = vmax.f32 %v3764_v55, 0.0  ;;  %v3781_v60 = vadd.f32 %v2807_v52, %v5462_v6  ;;  %v3766_v43 = vadd.f32 %v2663_v32, %v5465_v13  ;;  %v2809_v14 = vpop.f32.mrb[35].mxu1 }
 0x50a   :  { %v2849_v2 = vadd.f32 %v2848_v31, %v2836_v23  ;;  %v2839_v62 = vmax.f32 %v3780_v24, 0.0  ;;  %v2840_v16 = vmax.f32 %v3765_v28, 0.0  ;;  %v3782_v34 = vadd.f32 %v2809_v14, %v5468_v10 }
 0x50b   :  { %v2875_v21 = vadd.f32 %v2874_v3, %v2838_v19  ;;  %v2862_v8 = vadd.f32 %v2861_v61, %v2837_v33  ;;  %v2842_v12 = vmax.f32 %v3781_v60, 0.0  ;;  %v2841_v20 = vmax.f32 %v3766_v43, 0.0 }
 0x50c   :  { %v2888_v0 = vadd.f32 %v2887_v40, %v2839_v62  ;;  %v2850_v63 = vadd.f32 %v2849_v2, %v2840_v16  ;;  %v2843_v26 = vmax.f32 %v3782_v34, 0.0 }
 0x50d   :  { %v2876_v5 = vadd.f32 %v2875_v21, %v2842_v12  ;;  %v2863_v15 = vadd.f32 %v2862_v8, %v2841_v20 }
 0x50e   :  { %v2851_v1 = vrot.slane %v2850_v63, 4  ;;  %v2889_v7 = vadd.f32 %v2888_v0, %v2843_v26 }
 0x50f   :  { %v2877_v6 = vrot.slane %v2876_v5, 4  ;;  %v2864_v47 = vrot.slane %v2863_v15, 4 }
 0x510   :  { %v2852_v13 = vadd.f32 %v2851_v1, %v2850_v63  ;;  %v2890_v48 = vrot.slane %v2889_v7, 4 }
 0x511   :  { %v2878_v49 = vadd.f32 %v2877_v6, %v2876_v5  ;;  %v2865_v54 = vadd.f32 %v2864_v47, %v2863_v15 }
 0x512   :  { %v2853_v41 = vrot.slane %v2852_v13, 2  ;;  %v2891_v44 = vadd.f32 %v2890_v48, %v2889_v7 }
 0x513   :  { %v2879_v10 = vrot.slane %v2878_v49, 2  ;;  %v2866_v42 = vrot.slane %v2865_v54, 2 }
 0x514   :  { %v2854_v29 = vadd.f32 %v2853_v41, %v2852_v13  ;;  %v2892_v36 = vrot.slane %v2891_v44, 2 }
 0x515   :  { %v2880_v17 = vadd.f32 %v2879_v10, %v2878_v49  ;;  %v2867_v27 = vadd.f32 %v2866_v42, %v2865_v54 }
 0x516   :  { %v2855_v18 = vrot.slane %v2854_v29, 1  ;;  %v2893_v9 = vadd.f32 %v2892_v36, %v2891_v44 }
 0x517   :  { %v2881_v35 = vrot.slane %v2880_v17, 1  ;;  %v2868_v30 = vrot.slane %v2867_v27, 1 }
 0x518   :  { %v2894_v4 = vrot.slane %v2893_v9, 1  ;;  %v2856_v39 = vadd.f32 %v2855_v18, %v2854_v29 }
 0x519   :  { %v2869_v37 = vadd.f32 %v2868_v30, %v2867_v27  ;;  %v2882_v50 = vadd.f32 %v2881_v35, %v2880_v17 }
 0x51a   :  { %v2895_v38 = vadd.f32 %v2894_v4, %v2893_v9 }
 0x51b   :  { %3100 = vmatprep.mubr.f32.mxu0 %v2869_v37 }
 0x51c   :  { %3170 = vmatprep.mubr.f32.mxu1 %v2895_v38  ;;  %3101 = vmatmul.mubr.f32.vlgmr.msra.gmra.mrb[38].mxu0 %v2856_v39 }
 0x51d   :  { %3171 = vmatmul.mubr.f32.vlgmr.msra.gmra.mrb[38].mxu1 %v2882_v50 }
 0x552   :  { %v3443_v58 = vpop.f32.mrb[36].mxu0 }
 0x553   :  { %v3478_v59 = vpop.f32.mrb[36].mxu1  ;;  %v3444_v22 = vpop.f32.mrb[37].mxu0 }
 0x554   :  { %v3479_v31 = vpop.f32.mrb[37].mxu1  ;;  %v3445_v11 = vadd.f32 %v3444_v22, %v3443_v58 }
 0x555   :  { %v3480_v3 = vadd.f32 %v3479_v31, %v3478_v59 }
 0x557   :  { %v3033_v61 = vadd.f32 %v3480_v3, %v3445_v11 }
 0x559   :  { %v3176_v55 = vmul.f32 0.125, %v3033_v61 }
 0x55b   :  { %v3177_v24 = vadd.f32 %v3176_v55, %v1230_v57 }
 0x5ef   :  { %v3513_v25 = vpop.f32.mrb[38].mxu0 }
 0x5f0   :  { %v3548_v40 = vpop.f32.mrb[38].mxu1  ;;  %v3514_v45 = vpop.f32.mrb[39].mxu0 }
 0x5f1   :  { %v3515_v46 = vadd.f32 %v3514_v45, %v3513_v25  ;;  %v3549_v51 = vpop.f32.mrb[39].mxu1 }
 0x5f2   :  { %v3550_v53 = vadd.f32 %v3549_v51, %v3548_v40 }
 0x5f4   :  { %v3173_v56 = vadd.f32 %v3550_v53, %v3515_v46 }
 0x5f6   :  { %v3178_v23 = vmul.f32 0.015625, %v3173_v56 }
 0x5f8   :  { %v3179_v28 = vadd.f32 %v3178_v23, %v1230_v57 }
 0x5fa   :  { %v3180_v52 = vsub.f32 %v3177_v24, %v3179_v28 }
 0x5fc   :  { %3182 = vst.msk [vmem:[#allocation6] sm:$0x1] %vm3181_vm4, %v3180_v52 }
 0x5fd   :  { %4087 = shalt.err (!%p4084_p12)
}
 0x5fe   :  { %s4088_s4 = scalar_lea.hbm %s5568_s20, 16 }
 0x5ff   :  { %p4089_p13 = scmp.ne.s32.totalorder %s5568_s20, %s4088_s4  ;;  %p4092_p0 = scmp.lt.u32.totalorder %s4088_s4, %s5568_s20 }
 0x601   :  { %p4094_p1 = pnand %p4092_p0, %p4089_p13 }
 0x603   :  { %4097 = shalt.err (!%p4094_p1)
}
 0x604   :  { %3192 = dma.vmem_to_hbm [thread:$0]  %s3190_s26, 16, %s5568_s20, [#allocation5]  }
 0x605   :  { %4100 = dma.done.wait [#allocation5], 16  }
 0x606   :  { %4101 = vsyncadd [#allocation5], 4294967280 }
 0x607   :  { %3196 = vsyncpa [#allocation4], 1 }
 0x608   :  { %3197 = vsyncpa [#allocation5], 1 }

</bundles_post_ra>
